<compile_context>
chip_gen: v7x
topology: tpu7x:2x2x1
jax: 0.10.0
libtpu: 0.0.40
codegen_flags: <defaults>
</compile_context>

<pallas_src>
import jax
import jax.numpy as jnp
from jax.experimental import pallas as pl
from jax.experimental.pallas import tpu as pltpu


def _round_up(x, m):
    return ((x + m - 1) // m) * m


def _pick_row_tile(rows, cap):
    """Row tile: multiple of 16 (bf16 sublane packing), <= cap, sized so the
    (parallel) grid axis gets >= 2 steps whenever there is enough work, so both
    v7x TensorCores receive tiles."""
    half = -(-rows // 2)                      # ceil(rows / 2)
    return max(16, min(cap, _round_up(half, 16)))


_VMEM_LIMIT = 48 * 1024 * 1024   # < 64 MiB physical VMEM on v7x; ample on v5e/v6e


# ----------------------------- Pallas kernels ------------------------------


def _conv_relu_pool_kernel(p_ref, w_ref, b_ref, o_ref):
    """One row tile of fused conv(+bias)+ReLU+2x2 max-pool.

    p_ref: [4, tm, Kpad] bf16  im2col patches for the 4 pool quadrants
    w_ref: [Kpad, 128]   bf16  conv weights, K and OC zero-padded, cols=(kh,kw,c)
    b_ref: [1, 128]      f32   bias (zero-padded)
    o_ref: [tm, 128]     bf16  pooled activations (rows=(n,ph,pw), lanes=oc)
    """
    w = w_ref[...]
    b = b_ref[...]
    acc = None
    for q in range(4):                                   # unrolled, q static
        y = jnp.dot(p_ref[q], w, preferred_element_type=jnp.float32)
        y = jnp.maximum(y + b, 0.0)                      # conv + bias + ReLU
        acc = y if acc is None else jnp.maximum(acc, y)  # fused 2x2 max-pool
    o_ref[...] = acc.astype(o_ref.dtype)


def _mlp_kernel(x_ref, w1_ref, b1_ref, w2_ref, b2_ref, w3_ref, b3_ref, o_ref):
    """Fused fc1+ReLU -> fc2+ReLU -> fc3 on one batch-row tile (lanes padded to 128)."""
    h = jnp.dot(x_ref[...], w1_ref[...], preferred_element_type=jnp.float32)
    h = jnp.maximum(h + b1_ref[...], 0.0)
    h = jnp.dot(h.astype(jnp.bfloat16), w2_ref[...], preferred_element_type=jnp.float32)
    h = jnp.maximum(h + b2_ref[...], 0.0)
    h = jnp.dot(h.astype(jnp.bfloat16), w3_ref[...], preferred_element_type=jnp.float32)
    o_ref[...] = (h + b3_ref[...]).astype(o_ref.dtype)


# ------------------------------ XLA-side glue -------------------------------


def _im2col_quadrants_nhwc(x, k, PH, PW):
    """x:[N,H,W,C] (bf16) -> [4, N*PH*PW, k*k*C], quadrant-major.

    Quadrant q = 2*dh + dw of the 2x2 pool window is outermost; rows ordered
    (n, ph, pw); columns ordered (kh, kw, c) to match the prepared weights.
    Element [q, (n,ph,pw), (kh,kw,c)] = x[n, 2*ph+dh+kh, 2*pw+dw+kw, c].
    """
    N, H, W, C = x.shape
    OH, OW = 2 * PH, 2 * PW
    taps = [x[:, kh:kh + OH, kw:kw + OW, :] for kh in range(k) for kw in range(k)]
    p = jnp.stack(taps, axis=3)                        # [N, OH, OW, k*k, C]
    p = p.reshape(N, PH, 2, PW, 2, k * k * C)          # split (ph,dh), (pw,dw)
    p = p.transpose(2, 4, 0, 1, 3, 5)                  # [dh, dw, N, PH, PW, K]
    return p.reshape(4, N * PH * PW, k * k * C)


# ------------------------------ Pallas wrappers -----------------------------


def conv_relu_pool(x, w_pad, b_pad, *, k, OC):
    """Valid conv(k, stride 1) + bias + ReLU + 2x2/2 max-pool, one pallas_call.

    x: [N, H, W, C] NHWC; w_pad: [Kpad, 128]; b_pad: [1, 128].
    Returns [N, PH, PW, OC] bf16 (NHWC — no transposes on the critical path).
    """
    x = x.astype(jnp.bfloat16)                  # cast BEFORE im2col / padding
    N, H, W, C = x.shape
    OH, OW = H - k + 1, W - k + 1
    PH, PW = OH // 2, OW // 2
    K = k * k * C
    Kpad = w_pad.shape[0]

    npool = N * PH * PW
    tm = _pick_row_tile(npool, cap=1024)
    npool_pad = _round_up(npool, tm)

    patches = _im2col_quadrants_nhwc(x, k, PH, PW)               # [4, npool, K] bf16
    patches = jnp.pad(patches, ((0, 0), (0, npool_pad - npool), (0, Kpad - K)))

    out = pl.pallas_call(
        _conv_relu_pool_kernel,
        out_shape=jax.ShapeDtypeStruct((npool_pad, 128), jnp.bfloat16),
        grid=(npool_pad // tm,),
        in_specs=[
            pl.BlockSpec((4, tm, Kpad), lambda i: (0, i, 0)),
            pl.BlockSpec((Kpad, 128), lambda i: (0, 0)),
            pl.BlockSpec((1, 128), lambda i: (0, 0)),
        ],
        out_specs=pl.BlockSpec((tm, 128), lambda i: (i, 0)),
        compiler_params=pltpu.CompilerParams(
            dimension_semantics=("parallel",),
            vmem_limit_bytes=_VMEM_LIMIT),
    )(patches, w_pad, b_pad)

    return out[:npool, :OC].reshape(N, PH, PW, OC)               # stays NHWC


def fused_mlp(x, w1, b1, w2, b2, w3, b3, *, out_dim):
    """fc1+ReLU -> fc2+ReLU -> fc3 in one pallas_call. x: [N, K_features]."""
    N, K = x.shape
    Kpad = w1.shape[0]
    tb = _pick_row_tile(N, cap=512)
    Npad = _round_up(N, tb)
    xp = jnp.pad(x.astype(jnp.bfloat16), ((0, Npad - N), (0, Kpad - K)))

    out = pl.pallas_call(
        _mlp_kernel,
        out_shape=jax.ShapeDtypeStruct((Npad, 128), jnp.bfloat16),
        grid=(Npad // tb,),
        in_specs=[
            pl.BlockSpec((tb, Kpad), lambda i: (i, 0)),
            pl.BlockSpec(w1.shape, lambda i: (0, 0)),
            pl.BlockSpec((1, 128), lambda i: (0, 0)),
            pl.BlockSpec(w2.shape, lambda i: (0, 0)),
            pl.BlockSpec((1, 128), lambda i: (0, 0)),
            pl.BlockSpec(w3.shape, lambda i: (0, 0)),
            pl.BlockSpec((1, 128), lambda i: (0, 0)),
        ],
        out_specs=pl.BlockSpec((tb, 128), lambda i: (i, 0)),
        compiler_params=pltpu.CompilerParams(
            dimension_semantics=("parallel",),
            vmem_limit_bytes=_VMEM_LIMIT),
    )(xp, w1, b1, w2, b2, w3, b3)
    return out[:N, :out_dim].astype(jnp.float32)


# --------------------------- parameters & forward ---------------------------


def init_params(key):
    """Deterministic PyTorch-default-style (uniform +/- 1/sqrt(fan_in)) init."""
    def uni(k, shape, fan_in):
        bound = 1.0 / (fan_in ** 0.5)
        return jax.random.uniform(k, shape, jnp.float32, -bound, bound)

    ks = jax.random.split(key, 10)
    return {
        "conv1_w": uni(ks[0], (6, 3, 5, 5), 3 * 5 * 5),
        "conv1_b": uni(ks[1], (6,), 3 * 5 * 5),
        "conv2_w": uni(ks[2], (16, 6, 5, 5), 6 * 5 * 5),
        "conv2_b": uni(ks[3], (16,), 6 * 5 * 5),
        "fc1_w": uni(ks[4], (120, 400), 400),
        "fc1_b": uni(ks[5], (120,), 400),
        "fc2_w": uni(ks[6], (84, 120), 120),
        "fc2_b": uni(ks[7], (84,), 120),
        "fc3_w": uni(ks[8], (10, 84), 84),
        "fc3_b": uni(ks[9], (10,), 84),
    }


def prepare_params(params):
    """One-time conversion: NHWC weight column order (kh,kw,c), fc1 row permutation
    to the NHWC flatten order, zero-pad to 128 lanes / 128-aligned K, bf16 weights."""
    def conv_w(w):                       # [OC, C, k, k] -> [Kpad, 128] bf16
        OC, C, k, _ = w.shape
        K = k * k * C
        Kpad = _round_up(K, 128)
        wt = jnp.transpose(w, (2, 3, 1, 0)).reshape(K, OC)   # rows (kh,kw,c)
        return jnp.pad(wt, ((0, Kpad - K), (0, 128 - OC))).astype(jnp.bfloat16)

    def fc_w(w):                         # [out, in] -> [in_pad, 128] bf16
        out_d, in_d = w.shape
        in_pad = _round_up(in_d, 128)
        return jnp.pad(w.T, ((0, in_pad - in_d), (0, 128 - out_d))).astype(jnp.bfloat16)

    def bias(b):
        return jnp.pad(b, (0, 128 - b.shape[0])).reshape(1, 128).astype(jnp.float32)

    # fc1 input features: PyTorch flattens NCHW -> (c, h, w); our conv2 output is
    # NHWC -> flatten (h, w, c). Permute once here.
    fc1_w = params["fc1_w"].reshape(120, 16, 5, 5).transpose(0, 2, 3, 1).reshape(120, 400)

    return {
        "conv1_w": conv_w(params["conv1_w"]), "conv1_b": bias(params["conv1_b"]),
        "conv2_w": conv_w(params["conv2_w"]), "conv2_b": bias(params["conv2_b"]),
        "fc1_w": fc_w(fc1_w), "fc1_b": bias(params["fc1_b"]),
        "fc2_w": fc_w(params["fc2_w"]), "fc2_b": bias(params["fc2_b"]),
        "fc3_w": fc_w(params["fc3_w"]), "fc3_b": bias(params["fc3_b"]),
    }


@jax.jit
def net_forward(prep, x):
    # x: [N, 3, 32, 32] NCHW float32 (PyTorch-compatible). One NHWC transpose at
    # the boundary; everything downstream stays NHWC / bf16.
    x = jnp.transpose(x, (0, 2, 3, 1))                                    # [N,32,32,3]
    x = conv_relu_pool(x, prep["conv1_w"], prep["conv1_b"], k=5, OC=6)    # [N,14,14,6]
    x = conv_relu_pool(x, prep["conv2_w"], prep["conv2_b"], k=5, OC=16)   # [N,5,5,16]
    x = x.reshape(x.shape[0], 5 * 5 * 16)                                 # (h,w,c) order
    return fused_mlp(x, prep["fc1_w"], prep["fc1_b"],
                     prep["fc2_w"], prep["fc2_b"],
                     prep["fc3_w"], prep["fc3_b"], out_dim=10)            # [N,10] f32


def _reference_forward(params, x):
    """Pure-JAX f32 reference matching the PyTorch module exactly."""
    def conv(x, w, b):
        y = jax.lax.conv_general_dilated(x, w, (1, 1), "VALID",
                                         dimension_numbers=("NCHW", "OIHW", "NCHW"))
        return jax.nn.relu(y + b[None, :, None, None])

    def pool(x):
        return jax.lax.reduce_window(x, -jnp.inf, jax.lax.max,
                                     (1, 1, 2, 2), (1, 1, 2, 2), "VALID")

    x = pool(conv(x, params["conv1_w"], params["conv1_b"]))
    x = pool(conv(x, params["conv2_w"], params["conv2_b"]))
    x = x.reshape(x.shape[0], -1)
    x = jax.nn.relu(x @ params["fc1_w"].T + params["fc1_b"])
    x = jax.nn.relu(x @ params["fc2_w"].T + params["fc2_b"])
    return x @ params["fc3_w"].T + params["fc3_b"]


if __name__ == "__main__":
    key = jax.random.PRNGKey(0)
    pkey, xkey = jax.random.split(key)
    params = init_params(pkey)
    prep = prepare_params(params)                       # hoisted out of forward
    x = jax.random.normal(xkey, (2, 3, 32, 32), dtype=jnp.float32)  # CIFAR10-shaped

    out = net_forward(prep, x)
    out = jax.block_until_ready(out)
    assert out.shape == (2, 10), out.shape

    ref = jax.block_until_ready(_reference_forward(params, x))
    max_err = float(jnp.max(jnp.abs(out - ref)))
    # bf16 weights/activations with f32 accumulation: expect ~1e-2 abs deviation.
    assert max_err < 0.15, f"mismatch vs f32 reference: max abs err = {max_err}"

    print("KERNEL_OK")
</pallas_src>

<mosaic_0001>
module attributes {stable_mosaic.version = 11 : i64} {
  func.func @_conv_relu_pool_kernel(%arg0: i32, %arg1: memref<4x208x128xbf16, #tpu.memory_space<vmem>>, %arg2: memref<128x128xbf16, #tpu.memory_space<vmem>>, %arg3: memref<1x128xf32, #tpu.memory_space<vmem>>, %arg4: memref<208x128xbf16, #tpu.memory_space<vmem>>) attributes {dimension_semantics = [#tpu.dimension_semantics<parallel>], iteration_bounds = array<i64: 2>, scalar_prefetch = 0 : i64, scratch_operands = 0 : i64, tpu.core_type = #tpu.core_type<tc>, window_params = [{transform_indices = @transform_0, window_bounds = array<i64: 4, 208, 128>}, {pipeline_mode = #tpu.pipeline_mode<synchronous>, transform_indices = @transform_1, window_bounds = array<i64: 128, 128>}, {pipeline_mode = #tpu.pipeline_mode<synchronous>, transform_indices = @transform_2, window_bounds = array<i64: 1, 128>}, {transform_indices = @transform_3, window_bounds = array<i64: 208, 128>}]} {
    %c0 = arith.constant 0 : index
    %c0_0 = arith.constant 0 : index
    %0 = vector.load %arg2[%c0, %c0_0] : memref<128x128xbf16, #tpu.memory_space<vmem>>, vector<128x128xbf16>
    %c0_1 = arith.constant 0 : index
    %c0_2 = arith.constant 0 : index
    %1 = vector.load %arg3[%c0_1, %c0_2] : memref<1x128xf32, #tpu.memory_space<vmem>>, vector<1x128xf32>
    %c0_3 = arith.constant 0 : index
    %c0_4 = arith.constant 0 : index
    %c0_5 = arith.constant 0 : index
    %2 = vector.load %arg1[%c0_3, %c0_4, %c0_5] : memref<4x208x128xbf16, #tpu.memory_space<vmem>>, vector<1x208x128xbf16>
    %3 = vector.shape_cast %2 : vector<1x208x128xbf16> to vector<208x128xbf16>
    %cst = arith.constant dense<0.000000e+00> : vector<208x128xf32>
    %4 = tpu.matmul %3, %0, %cst {dimension_numbers = #tpu.dot_dimension_numbers<[1], [0], [0], [1], [0, 0, 1, 1], [], []>} : vector<208x128xbf16>, vector<128x128xbf16>, vector<208x128xf32> -> vector<208x128xf32>
    %5 = vector.broadcast %1 : vector<1x128xf32> to vector<208x128xf32>
    %6 = arith.addf %4, %5 : vector<208x128xf32>
    %cst_6 = arith.constant 0.000000e+00 : f32
    %7 = vector.broadcast %cst_6 : f32 to vector<208x128xf32>
    %8 = arith.maximumf %6, %7 : vector<208x128xf32>
    %c1 = arith.constant 1 : index
    %c0_7 = arith.constant 0 : index
    %c0_8 = arith.constant 0 : index
    %9 = vector.load %arg1[%c1, %c0_7, %c0_8] : memref<4x208x128xbf16, #tpu.memory_space<vmem>>, vector<1x208x128xbf16>
    %10 = vector.shape_cast %9 : vector<1x208x128xbf16> to vector<208x128xbf16>
    %cst_9 = arith.constant dense<0.000000e+00> : vector<208x128xf32>
    %11 = tpu.matmul %10, %0, %cst_9 {dimension_numbers = #tpu.dot_dimension_numbers<[1], [0], [0], [1], [0, 0, 1, 1], [], []>} : vector<208x128xbf16>, vector<128x128xbf16>, vector<208x128xf32> -> vector<208x128xf32>
    %12 = vector.broadcast %1 : vector<1x128xf32> to vector<208x128xf32>
    %13 = arith.addf %11, %12 : vector<208x128xf32>
    %cst_10 = arith.constant 0.000000e+00 : f32
    %14 = vector.broadcast %cst_10 : f32 to vector<208x128xf32>
    %15 = arith.maximumf %13, %14 : vector<208x128xf32>
    %16 = arith.maximumf %8, %15 : vector<208x128xf32>
    %c2 = arith.constant 2 : index
    %c0_11 = arith.constant 0 : index
    %c0_12 = arith.constant 0 : index
    %17 = vector.load %arg1[%c2, %c0_11, %c0_12] : memref<4x208x128xbf16, #tpu.memory_space<vmem>>, vector<1x208x128xbf16>
    %18 = vector.shape_cast %17 : vector<1x208x128xbf16> to vector<208x128xbf16>
    %cst_13 = arith.constant dense<0.000000e+00> : vector<208x128xf32>
    %19 = tpu.matmul %18, %0, %cst_13 {dimension_numbers = #tpu.dot_dimension_numbers<[1], [0], [0], [1], [0, 0, 1, 1], [], []>} : vector<208x128xbf16>, vector<128x128xbf16>, vector<208x128xf32> -> vector<208x128xf32>
    %20 = vector.broadcast %1 : vector<1x128xf32> to vector<208x128xf32>
    %21 = arith.addf %19, %20 : vector<208x128xf32>
    %cst_14 = arith.constant 0.000000e+00 : f32
    %22 = vector.broadcast %cst_14 : f32 to vector<208x128xf32>
    %23 = arith.maximumf %21, %22 : vector<208x128xf32>
    %24 = arith.maximumf %16, %23 : vector<208x128xf32>
    %c3 = arith.constant 3 : index
    %c0_15 = arith.constant 0 : index
    %c0_16 = arith.constant 0 : index
    %25 = vector.load %arg1[%c3, %c0_15, %c0_16] : memref<4x208x128xbf16, #tpu.memory_space<vmem>>, vector<1x208x128xbf16>
    %26 = vector.shape_cast %25 : vector<1x208x128xbf16> to vector<208x128xbf16>
    %cst_17 = arith.constant dense<0.000000e+00> : vector<208x128xf32>
    %27 = tpu.matmul %26, %0, %cst_17 {dimension_numbers = #tpu.dot_dimension_numbers<[1], [0], [0], [1], [0, 0, 1, 1], [], []>} : vector<208x128xbf16>, vector<128x128xbf16>, vector<208x128xf32> -> vector<208x128xf32>
    %28 = vector.broadcast %1 : vector<1x128xf32> to vector<208x128xf32>
    %29 = arith.addf %27, %28 : vector<208x128xf32>
    %cst_18 = arith.constant 0.000000e+00 : f32
    %30 = vector.broadcast %cst_18 : f32 to vector<208x128xf32>
    %31 = arith.maximumf %29, %30 : vector<208x128xf32>
    %32 = arith.maximumf %24, %31 : vector<208x128xf32>
    %33 = arith.truncf %32 : vector<208x128xf32> to vector<208x128xbf16>
    %c0_19 = arith.constant 0 : index
    %c0_20 = arith.constant 0 : index
    %34 = vector.load %arg4[%c0_19, %c0_20] : memref<208x128xbf16, #tpu.memory_space<vmem>>, vector<208x128xbf16>
    tpu.vector_store %arg4[%c0_19, %c0_20], %33 {strides = array<i32>} : memref<208x128xbf16, #tpu.memory_space<vmem>>, vector<208x128xbf16>,
    return
  }
  func.func @transform_0(%arg0: i32) -> (i32, i32, i32) {
    %c0_i32 = arith.constant 0 : i32
    %c0_i32_0 = arith.constant 0 : i32
    %c0_i32_1 = arith.constant 0 : i32
    return %c0_i32, %arg0, %c0_i32_0 : i32, i32, i32
  }
  func.func @transform_1(%arg0: i32) -> (i32, i32) {
    %c0_i32 = arith.constant 0 : i32
    %c0_i32_0 = arith.constant 0 : i32
    %c0_i32_1 = arith.constant 0 : i32
    return %c0_i32, %c0_i32_0 : i32, i32
  }
  func.func @transform_2(%arg0: i32) -> (i32, i32) {
    %c0_i32 = arith.constant 0 : i32
    %c0_i32_0 = arith.constant 0 : i32
    %c0_i32_1 = arith.constant 0 : i32
    return %c0_i32, %c0_i32_0 : i32, i32
  }
  func.func @transform_3(%arg0: i32) -> (i32, i32) {
    %c0_i32 = arith.constant 0 : i32
    %c0_i32_0 = arith.constant 0 : i32
    return %arg0, %c0_i32 : i32, i32
  }
}

module attributes {stable_mosaic.version = 11 : i64} {
  func.func @_conv_relu_pool_kernel(%arg0: i32, %arg1: memref<4x32x256xbf16, #tpu.memory_space<vmem>>, %arg2: memref<256x128xbf16, #tpu.memory_space<vmem>>, %arg3: memref<1x128xf32, #tpu.memory_space<vmem>>, %arg4: memref<32x128xbf16, #tpu.memory_space<vmem>>) attributes {dimension_semantics = [#tpu.dimension_semantics<parallel>], iteration_bounds = array<i64: 2>, scalar_prefetch = 0 : i64, scratch_operands = 0 : i64, tpu.core_type = #tpu.core_type<tc>, window_params = [{transform_indices = @transform_0, window_bounds = array<i64: 4, 32, 256>}, {pipeline_mode = #tpu.pipeline_mode<synchronous>, transform_indices = @transform_1, window_bounds = array<i64: 256, 128>}, {pipeline_mode = #tpu.pipeline_mode<synchronous>, transform_indices = @transform_2, window_bounds = array<i64: 1, 128>}, {transform_indices = @transform_3, window_bounds = array<i64: 32, 128>}]} {
    %c0 = arith.constant 0 : index
    %c0_0 = arith.constant 0 : index
    %0 = vector.load %arg2[%c0, %c0_0] : memref<256x128xbf16, #tpu.memory_space<vmem>>, vector<256x128xbf16>
    %c0_1 = arith.constant 0 : index
    %c0_2 = arith.constant 0 : index
    %1 = vector.load %arg3[%c0_1, %c0_2] : memref<1x128xf32, #tpu.memory_space<vmem>>, vector<1x128xf32>
    %c0_3 = arith.constant 0 : index
    %c0_4 = arith.constant 0 : index
    %c0_5 = arith.constant 0 : index
    %2 = vector.load %arg1[%c0_3, %c0_4, %c0_5] : memref<4x32x256xbf16, #tpu.memory_space<vmem>>, vector<1x32x256xbf16>
    %3 = vector.shape_cast %2 : vector<1x32x256xbf16> to vector<32x256xbf16>
    %cst = arith.constant dense<0.000000e+00> : vector<32x128xf32>
    %4 = tpu.matmul %3, %0, %cst {dimension_numbers = #tpu.dot_dimension_numbers<[1], [0], [0], [1], [0, 0, 1, 1], [], []>} : vector<32x256xbf16>, vector<256x128xbf16>, vector<32x128xf32> -> vector<32x128xf32>
    %5 = vector.broadcast %1 : vector<1x128xf32> to vector<32x128xf32>
    %6 = arith.addf %4, %5 : vector<32x128xf32>
    %cst_6 = arith.constant 0.000000e+00 : f32
    %7 = vector.broadcast %cst_6 : f32 to vector<32x128xf32>
    %8 = arith.maximumf %6, %7 : vector<32x128xf32>
    %c1 = arith.constant 1 : index
    %c0_7 = arith.constant 0 : index
    %c0_8 = arith.constant 0 : index
    %9 = vector.load %arg1[%c1, %c0_7, %c0_8] : memref<4x32x256xbf16, #tpu.memory_space<vmem>>, vector<1x32x256xbf16>
    %10 = vector.shape_cast %9 : vector<1x32x256xbf16> to vector<32x256xbf16>
    %cst_9 = arith.constant dense<0.000000e+00> : vector<32x128xf32>
    %11 = tpu.matmul %10, %0, %cst_9 {dimension_numbers = #tpu.dot_dimension_numbers<[1], [0], [0], [1], [0, 0, 1, 1], [], []>} : vector<32x256xbf16>, vector<256x128xbf16>, vector<32x128xf32> -> vector<32x128xf32>
    %12 = vector.broadcast %1 : vector<1x128xf32> to vector<32x128xf32>
    %13 = arith.addf %11, %12 : vector<32x128xf32>
    %cst_10 = arith.constant 0.000000e+00 : f32
    %14 = vector.broadcast %cst_10 : f32 to vector<32x128xf32>
    %15 = arith.maximumf %13, %14 : vector<32x128xf32>
    %16 = arith.maximumf %8, %15 : vector<32x128xf32>
    %c2 = arith.constant 2 : index
    %c0_11 = arith.constant 0 : index
    %c0_12 = arith.constant 0 : index
    %17 = vector.load %arg1[%c2, %c0_11, %c0_12] : memref<4x32x256xbf16, #tpu.memory_space<vmem>>, vector<1x32x256xbf16>
    %18 = vector.shape_cast %17 : vector<1x32x256xbf16> to vector<32x256xbf16>
    %cst_13 = arith.constant dense<0.000000e+00> : vector<32x128xf32>
    %19 = tpu.matmul %18, %0, %cst_13 {dimension_numbers = #tpu.dot_dimension_numbers<[1], [0], [0], [1], [0, 0, 1, 1], [], []>} : vector<32x256xbf16>, vector<256x128xbf16>, vector<32x128xf32> -> vector<32x128xf32>
    %20 = vector.broadcast %1 : vector<1x128xf32> to vector<32x128xf32>
    %21 = arith.addf %19, %20 : vector<32x128xf32>
    %cst_14 = arith.constant 0.000000e+00 : f32
    %22 = vector.broadcast %cst_14 : f32 to vector<32x128xf32>
    %23 = arith.maximumf %21, %22 : vector<32x128xf32>
    %24 = arith.maximumf %16, %23 : vector<32x128xf32>
    %c3 = arith.constant 3 : index
    %c0_15 = arith.constant 0 : index
    %c0_16 = arith.constant 0 : index
    %25 = vector.load %arg1[%c3, %c0_15, %c0_16] : memref<4x32x256xbf16, #tpu.memory_space<vmem>>, vector<1x32x256xbf16>
    %26 = vector.shape_cast %25 : vector<1x32x256xbf16> to vector<32x256xbf16>
    %cst_17 = arith.constant dense<0.000000e+00> : vector<32x128xf32>
    %27 = tpu.matmul %26, %0, %cst_17 {dimension_numbers = #tpu.dot_dimension_numbers<[1], [0], [0], [1], [0, 0, 1, 1], [], []>} : vector<32x256xbf16>, vector<256x128xbf16>, vector<32x128xf32> -> vector<32x128xf32>
    %28 = vector.broadcast %1 : vector<1x128xf32> to vector<32x128xf32>
    %29 = arith.addf %27, %28 : vector<32x128xf32>
    %cst_18 = arith.constant 0.000000e+00 : f32
    %30 = vector.broadcast %cst_18 : f32 to vector<32x128xf32>
    %31 = arith.maximumf %29, %30 : vector<32x128xf32>
    %32 = arith.maximumf %24, %31 : vector<32x128xf32>
    %33 = arith.truncf %32 : vector<32x128xf32> to vector<32x128xbf16>
    %c0_19 = arith.constant 0 : index
    %c0_20 = arith.constant 0 : index
    %34 = vector.load %arg4[%c0_19, %c0_20] : memref<32x128xbf16, #tpu.memory_space<vmem>>, vector<32x128xbf16>
    tpu.vector_store %arg4[%c0_19, %c0_20], %33 {strides = array<i32>} : memref<32x128xbf16, #tpu.memory_space<vmem>>, vector<32x128xbf16>,
    return
  }
  func.func @transform_0(%arg0: i32) -> (i32, i32, i32) {
    %c0_i32 = arith.constant 0 : i32
    %c0_i32_0 = arith.constant 0 : i32
    %c0_i32_1 = arith.constant 0 : i32
    return %c0_i32, %arg0, %c0_i32_0 : i32, i32, i32
  }
  func.func @transform_1(%arg0: i32) -> (i32, i32) {
    %c0_i32 = arith.constant 0 : i32
    %c0_i32_0 = arith.constant 0 : i32
    %c0_i32_1 = arith.constant 0 : i32
    return %c0_i32, %c0_i32_0 : i32, i32
  }
  func.func @transform_2(%arg0: i32) -> (i32, i32) {
    %c0_i32 = arith.constant 0 : i32
    %c0_i32_0 = arith.constant 0 : i32
    %c0_i32_1 = arith.constant 0 : i32
    return %c0_i32, %c0_i32_0 : i32, i32
  }
  func.func @transform_3(%arg0: i32) -> (i32, i32) {
    %c0_i32 = arith.constant 0 : i32
    %c0_i32_0 = arith.constant 0 : i32
    return %arg0, %c0_i32 : i32, i32
  }
}

module attributes {stable_mosaic.version = 11 : i64} {
  func.func @_mlp_kernel(%arg0: i32, %arg1: memref<16x512xbf16, #tpu.memory_space<vmem>>, %arg2: memref<512x128xbf16, #tpu.memory_space<vmem>>, %arg3: memref<1x128xf32, #tpu.memory_space<vmem>>, %arg4: memref<128x128xbf16, #tpu.memory_space<vmem>>, %arg5: memref<1x128xf32, #tpu.memory_space<vmem>>, %arg6: memref<128x128xbf16, #tpu.memory_space<vmem>>, %arg7: memref<1x128xf32, #tpu.memory_space<vmem>>, %arg8: memref<16x128xbf16, #tpu.memory_space<vmem>>) attributes {dimension_semantics = [#tpu.dimension_semantics<parallel>], iteration_bounds = array<i64: 1>, scalar_prefetch = 0 : i64, scratch_operands = 0 : i64, tpu.core_type = #tpu.core_type<tc>, window_params = [{transform_indices = @transform_0, window_bounds = array<i64: 16, 512>}, {pipeline_mode = #tpu.pipeline_mode<synchronous>, transform_indices = @transform_1, window_bounds = array<i64: 512, 128>}, {pipeline_mode = #tpu.pipeline_mode<synchronous>, transform_indices = @transform_2, window_bounds = array<i64: 1, 128>}, {pipeline_mode = #tpu.pipeline_mode<synchronous>, transform_indices = @transform_3, window_bounds = array<i64: 128, 128>}, {pipeline_mode = #tpu.pipeline_mode<synchronous>, transform_indices = @transform_4, window_bounds = array<i64: 1, 128>}, {pipeline_mode = #tpu.pipeline_mode<synchronous>, transform_indices = @transform_5, window_bounds = array<i64: 128, 128>}, {pipeline_mode = #tpu.pipeline_mode<synchronous>, transform_indices = @transform_6, window_bounds = array<i64: 1, 128>}, {transform_indices = @transform_7, window_bounds = array<i64: 16, 128>}]} {
    %c0 = arith.constant 0 : index
    %c0_0 = arith.constant 0 : index
    %0 = vector.load %arg1[%c0, %c0_0] : memref<16x512xbf16, #tpu.memory_space<vmem>>, vector<16x512xbf16>
    %c0_1 = arith.constant 0 : index
    %c0_2 = arith.constant 0 : index
    %1 = vector.load %arg2[%c0_1, %c0_2] : memref<512x128xbf16, #tpu.memory_space<vmem>>, vector<512x128xbf16>
    %cst = arith.constant dense<0.000000e+00> : vector<16x128xf32>
    %2 = tpu.matmul %0, %1, %cst {dimension_numbers = #tpu.dot_dimension_numbers<[1], [0], [0], [1], [0, 0, 1, 1], [], []>} : vector<16x512xbf16>, vector<512x128xbf16>, vector<16x128xf32> -> vector<16x128xf32>
    %c0_3 = arith.constant 0 : index
    %c0_4 = arith.constant 0 : index
    %3 = vector.load %arg3[%c0_3, %c0_4] : memref<1x128xf32, #tpu.memory_space<vmem>>, vector<1x128xf32>
    %4 = vector.broadcast %3 : vector<1x128xf32> to vector<16x128xf32>
    %5 = arith.addf %2, %4 : vector<16x128xf32>
    %cst_5 = arith.constant 0.000000e+00 : f32
    %6 = vector.broadcast %cst_5 : f32 to vector<16x128xf32>
    %7 = arith.maximumf %5, %6 : vector<16x128xf32>
    %8 = arith.truncf %7 : vector<16x128xf32> to vector<16x128xbf16>
    %c0_6 = arith.constant 0 : index
    %c0_7 = arith.constant 0 : index
    %9 = vector.load %arg4[%c0_6, %c0_7] : memref<128x128xbf16, #tpu.memory_space<vmem>>, vector<128x128xbf16>
    %cst_8 = arith.constant dense<0.000000e+00> : vector<16x128xf32>
    %10 = tpu.matmul %8, %9, %cst_8 {dimension_numbers = #tpu.dot_dimension_numbers<[1], [0], [0], [1], [0, 0, 1, 1], [], []>} : vector<16x128xbf16>, vector<128x128xbf16>, vector<16x128xf32> -> vector<16x128xf32>
    %c0_9 = arith.constant 0 : index
    %c0_10 = arith.constant 0 : index
    %11 = vector.load %arg5[%c0_9, %c0_10] : memref<1x128xf32, #tpu.memory_space<vmem>>, vector<1x128xf32>
    %12 = vector.broadcast %11 : vector<1x128xf32> to vector<16x128xf32>
    %13 = arith.addf %10, %12 : vector<16x128xf32>
    %cst_11 = arith.constant 0.000000e+00 : f32
    %14 = vector.broadcast %cst_11 : f32 to vector<16x128xf32>
    %15 = arith.maximumf %13, %14 : vector<16x128xf32>
    %16 = arith.truncf %15 : vector<16x128xf32> to vector<16x128xbf16>
    %c0_12 = arith.constant 0 : index
    %c0_13 = arith.constant 0 : index
    %17 = vector.load %arg6[%c0_12, %c0_13] : memref<128x128xbf16, #tpu.memory_space<vmem>>, vector<128x128xbf16>
    %cst_14 = arith.constant dense<0.000000e+00> : vector<16x128xf32>
    %18 = tpu.matmul %16, %17, %cst_14 {dimension_numbers = #tpu.dot_dimension_numbers<[1], [0], [0], [1], [0, 0, 1, 1], [], []>} : vector<16x128xbf16>, vector<128x128xbf16>, vector<16x128xf32> -> vector<16x128xf32>
    %c0_15 = arith.constant 0 : index
    %c0_16 = arith.constant 0 : index
    %19 = vector.load %arg7[%c0_15, %c0_16] : memref<1x128xf32, #tpu.memory_space<vmem>>, vector<1x128xf32>
    %20 = vector.broadcast %19 : vector<1x128xf32> to vector<16x128xf32>
    %21 = arith.addf %18, %20 : vector<16x128xf32>
    %22 = arith.truncf %21 : vector<16x128xf32> to vector<16x128xbf16>
    %c0_17 = arith.constant 0 : index
    %c0_18 = arith.constant 0 : index
    %23 = vector.load %arg8[%c0_17, %c0_18] : memref<16x128xbf16, #tpu.memory_space<vmem>>, vector<16x128xbf16>
    tpu.vector_store %arg8[%c0_17, %c0_18], %22 {strides = array<i32>} : memref<16x128xbf16, #tpu.memory_space<vmem>>, vector<16x128xbf16>,
    return
  }
  func.func @transform_0(%arg0: i32) -> (i32, i32) {
    %c0_i32 = arith.constant 0 : i32
    %c0_i32_0 = arith.constant 0 : i32
    return %arg0, %c0_i32 : i32, i32
  }
  func.func @transform_1(%arg0: i32) -> (i32, i32) {
    %c0_i32 = arith.constant 0 : i32
    %c0_i32_0 = arith.constant 0 : i32
    %c0_i32_1 = arith.constant 0 : i32
    return %c0_i32, %c0_i32_0 : i32, i32
  }
  func.func @transform_2(%arg0: i32) -> (i32, i32) {
    %c0_i32 = arith.constant 0 : i32
    %c0_i32_0 = arith.constant 0 : i32
    %c0_i32_1 = arith.constant 0 : i32
    return %c0_i32, %c0_i32_0 : i32, i32
  }
  func.func @transform_3(%arg0: i32) -> (i32, i32) {
    %c0_i32 = arith.constant 0 : i32
    %c0_i32_0 = arith.constant 0 : i32
    %c0_i32_1 = arith.constant 0 : i32
    return %c0_i32, %c0_i32_0 : i32, i32
  }
  func.func @transform_4(%arg0: i32) -> (i32, i32) {
    %c0_i32 = arith.constant 0 : i32
    %c0_i32_0 = arith.constant 0 : i32
    %c0_i32_1 = arith.constant 0 : i32
    return %c0_i32, %c0_i32_0 : i32, i32
  }
  func.func @transform_5(%arg0: i32) -> (i32, i32) {
    %c0_i32 = arith.constant 0 : i32
    %c0_i32_0 = arith.constant 0 : i32
    %c0_i32_1 = arith.constant 0 : i32
    return %c0_i32, %c0_i32_0 : i32, i32
  }
  func.func @transform_6(%arg0: i32) -> (i32, i32) {
    %c0_i32 = arith.constant 0 : i32
    %c0_i32_0 = arith.constant 0 : i32
    %c0_i32_1 = arith.constant 0 : i32
    return %c0_i32, %c0_i32_0 : i32, i32
  }
  func.func @transform_7(%arg0: i32) -> (i32, i32) {
    %c0_i32 = arith.constant 0 : i32
    %c0_i32_0 = arith.constant 0 : i32
    return %arg0, %c0_i32 : i32, i32
  }
}

</mosaic_0001>

<bundles_post_ra>
// kernel: net_forward.3
= control target key start
LH: loop header
LB: loop body
LE: loop exit
PB: predicated region body
PF: predicated region fallthrough
CT: control target
= control target key end

     0   :  { %s2809_s12 = smov 0   ;;  %s2811_s13 = smov 0   ;;  %s3386_s0 = inlined_call_operand.vmem [shape: bf16[4,416,128], index: 0, kind: input, shape index: {}]   ;;  %s3387_s1 = inlined_call_operand.vmem [shape: bf16[128,128], index: 1, kind: input, shape index: {}]   ;;  %s3388_s2 = inlined_call_operand.vmem [shape: f32[1,128], index: 2, kind: input, shape index: {}]   ;;  %s3389_s3 = inlined_call_operand.vmem [shape: bf16[416,128], index: 3, kind: output, shape index: {}]  }
   0x1   :  { %s2813_s14 = smov 0  }
   0x2 LB: > { %s2040_s15 = sadd.s32 4294967295, %s2785_s14   ;;  %s2826_s16 = sadd.s32 1, %s2785_s14   ;;  %s2785_s14 = sphi %s2813_s14, %s3392_s14   ;;  %s2781_s13 = sphi %s2811_s13, %s3391_s13   ;;  %s2777_s12 = sphi %s2809_s12, %s3390_s12  }
   0x3   : > { %s17_s17 = ssub.s32 %s2785_s14, %s2826_s16  ;;  %s20_s18 = sadd.s32 1, %s2781_s13 }
   0x4   : > { %p18_p0 = scmp.eq.s32.totalorder %s17_s17, 0  ;;  %p27_p1 = scmp.ne.s32.totalorder %s2781_s13, %s2777_s12 }
   0x5   : > { %p28_p2 = scmp.eq.s32.totalorder %s2785_s14, 0  ;;  %p2043_p4 = scmp.ge.s32.totalorder %s2785_s14, 2 }
   0x6   : > { %s2835_s19 = scalar_select %p18_p0, %s2781_s13, %s20_s18  }
   0x7   : > { %p29_p3 = por %p28_p2, %p27_p1  ;;  %127 = sbr.rel (%p2043_p4) target bundleno = 45 (0x2d), region = 24 }
   0xe   : > { %130 = sbr.rel (!%p29_p3) target bundleno = 45 (0x2d), region = 28  ;;  %s132_s20 = sand.u32 (%p29_p3), 1, %s2781_s13  }
   0xf   : > { %s2214_s21 = smul.u32 (%p29_p3), 104, %s2785_s14 }
  0x10   : > { %s2674_s22 = smul.u32 (%p29_p3), 416, %s132_s20 }
  0x11   : > { %s2843_s25 = scalar_lea.vmem (%p29_p3), %s3386_s0, %s2214_s21 }
  0x12   : > { %v153_v0 = vld [vmem:[%s2843_s25] sm:$0xff] (%p29_p3)   ;;  %v157_v1 = vld [vmem:[%s2843_s25 + $0x8] sm:$0xff] (%p29_p3)   ;;  %v161_v2 = vld [vmem:[%s2843_s25 + $0x10] sm:$0xff] (%p29_p3)   ;;  %s2848_s26 = scalar_lea.vmem (%p29_p3), [#allocation2], %s2674_s22 }
  0x13   : > { %154 = vst [vmem:[%s2848_s26] sm:$0xff] (%p29_p3), %v153_v0   ;;  %158 = vst [vmem:[%s2848_s26 + $0x8] sm:$0xff] (%p29_p3), %v157_v1   ;;  %v165_v3 = vld [vmem:[%s2843_s25 + $0x18] sm:$0xff] (%p29_p3)   ;;  %v169_v4 = vld [vmem:[%s2843_s25 + $0x20] sm:$0xff] (%p29_p3)  }
  0x14   : > { %162 = vst [vmem:[%s2848_s26 + $0x10] sm:$0xff] (%p29_p3), %v161_v2   ;;  %v173_v5 = vld [vmem:[%s2843_s25 + $0x28] sm:$0xff] (%p29_p3)   ;;  %166 = vst [vmem:[%s2848_s26 + $0x18] sm:$0xff] (%p29_p3), %v165_v3   ;;  %v177_v6 = vld [vmem:[%s2843_s25 + $0x30] sm:$0xff] (%p29_p3)  }
  0x15   : > { %170 = vst [vmem:[%s2848_s26 + $0x20] sm:$0xff] %v169_v4   ;;  %174 = vst [vmem:[%s2848_s26 + $0x28] sm:$0xff] %v173_v5   ;;  %v181_v7 = vld [vmem:[%s2843_s25 + $0x38] sm:$0xff]   ;;  %v185_v8 = vld [vmem:[%s2843_s25 + $0x40] sm:$0xff]  }
  0x16   : > { %178 = vst [vmem:[%s2848_s26 + $0x30] sm:$0xff] %v177_v6   ;;  %182 = vst [vmem:[%s2848_s26 + $0x38] sm:$0xff] %v181_v7   ;;  %v189_v9 = vld [vmem:[%s2843_s25 + $0x48] sm:$0xff]   ;;  %v193_v10 = vld [vmem:[%s2843_s25 + $0x50] sm:$0xff]  }
  0x17   : > { %186 = vst [vmem:[%s2848_s26 + $0x40] sm:$0xff] %v185_v8   ;;  %v197_v11 = vld [vmem:[%s2843_s25 + $0x58] sm:$0xff]   ;;  %190 = vst [vmem:[%s2848_s26 + $0x48] sm:$0xff] %v189_v9   ;;  %v201_v12 = vld [vmem:[%s2843_s25 + $0x60] sm:$0xff]  }
  0x18   : > { %194 = vst [vmem:[%s2848_s26 + $0x50] sm:$0xff] %v193_v10   ;;  %198 = vst [vmem:[%s2848_s26 + $0x58] sm:$0xff] %v197_v11   ;;  %v205_v13 = vld [vmem:[%s2843_s25 + $0xd0] sm:$0xff]   ;;  %v209_v14 = vld [vmem:[%s2843_s25 + $0xd8] sm:$0xff]  }
  0x19   : > { %202 = vst [vmem:[%s2848_s26 + $0x60] sm:$0xff] %v201_v12   ;;  %206 = vst [vmem:[%s2848_s26 + $0x68] sm:$0xff] %v205_v13   ;;  %v213_v15 = vld [vmem:[%s2843_s25 + $0xe0] sm:$0xff]   ;;  %v217_v16 = vld [vmem:[%s2843_s25 + $0xe8] sm:$0xff]  }
  0x1a   : > { %210 = vst [vmem:[%s2848_s26 + $0x70] sm:$0xff] %v209_v14   ;;  %v221_v17 = vld [vmem:[%s2843_s25 + $0xf0] sm:$0xff]   ;;  %214 = vst [vmem:[%s2848_s26 + $0x78] sm:$0xff] %v213_v15   ;;  %v225_v18 = vld [vmem:[%s2843_s25 + $0xf8] sm:$0xff]  }
  0x1b   : > { %218 = vst [vmem:[%s2848_s26 + $0x80] sm:$0xff] %v217_v16   ;;  %222 = vst [vmem:[%s2848_s26 + $0x88] sm:$0xff] %v221_v17   ;;  %v229_v19 = vld [vmem:[%s2843_s25 + $0x100] sm:$0xff]   ;;  %v233_v20 = vld [vmem:[%s2843_s25 + $0x108] sm:$0xff]  }
  0x1c   : > { %226 = vst [vmem:[%s2848_s26 + $0x90] sm:$0xff] %v225_v18   ;;  %230 = vst [vmem:[%s2848_s26 + $0x98] sm:$0xff] %v229_v19   ;;  %v237_v21 = vld [vmem:[%s2843_s25 + $0x110] sm:$0xff]   ;;  %v241_v22 = vld [vmem:[%s2843_s25 + $0x118] sm:$0xff]  }
  0x1d   : > { %234 = vst [vmem:[%s2848_s26 + $0xa0] sm:$0xff] %v233_v20   ;;  %v245_v23 = vld [vmem:[%s2843_s25 + $0x120] sm:$0xff]   ;;  %238 = vst [vmem:[%s2848_s26 + $0xa8] sm:$0xff] %v237_v21   ;;  %v249_v24 = vld [vmem:[%s2843_s25 + $0x128] sm:$0xff]  }
  0x1e   : > { %242 = vst [vmem:[%s2848_s26 + $0xb0] sm:$0xff] %v241_v22   ;;  %246 = vst [vmem:[%s2848_s26 + $0xb8] sm:$0xff] %v245_v23   ;;  %v253_v25 = vld [vmem:[%s2843_s25 + $0x130] sm:$0xff]   ;;  %v257_v26 = vld [vmem:[%s2843_s25 + $0x1a0] sm:$0xff]  }
  0x1f   : > { %250 = vst [vmem:[%s2848_s26 + $0xc0] sm:$0xff] %v249_v24   ;;  %254 = vst [vmem:[%s2848_s26 + $0xc8] sm:$0xff] %v253_v25   ;;  %v261_v27 = vld [vmem:[%s2843_s25 + $0x1a8] sm:$0xff]   ;;  %v265_v28 = vld [vmem:[%s2843_s25 + $0x1b0] sm:$0xff]  }
  0x20   : > { %258 = vst [vmem:[%s2848_s26 + $0xd0] sm:$0xff] %v257_v26   ;;  %v269_v29 = vld [vmem:[%s2843_s25 + $0x1b8] sm:$0xff]   ;;  %262 = vst [vmem:[%s2848_s26 + $0xd8] sm:$0xff] %v261_v27   ;;  %v273_v30 = vld [vmem:[%s2843_s25 + $0x1c0] sm:$0xff]  }
  0x21   : > { %266 = vst [vmem:[%s2848_s26 + $0xe0] sm:$0xff] %v265_v28   ;;  %270 = vst [vmem:[%s2848_s26 + $0xe8] sm:$0xff] %v269_v29   ;;  %v277_v31 = vld [vmem:[%s2843_s25 + $0x1c8] sm:$0xff]   ;;  %v281_v32 = vld [vmem:[%s2843_s25 + $0x1d0] sm:$0xff]  }
  0x22   : > { %274 = vst [vmem:[%s2848_s26 + $0xf0] sm:$0xff] %v273_v30   ;;  %278 = vst [vmem:[%s2848_s26 + $0xf8] sm:$0xff] %v277_v31   ;;  %v285_v33 = vld [vmem:[%s2843_s25 + $0x1d8] sm:$0xff]   ;;  %v289_v34 = vld [vmem:[%s2843_s25 + $0x1e0] sm:$0xff]  }
  0x23   : > { %282 = vst [vmem:[%s2848_s26 + $0x100] sm:$0xff] %v281_v32   ;;  %v293_v35 = vld [vmem:[%s2843_s25 + $0x1e8] sm:$0xff]   ;;  %286 = vst [vmem:[%s2848_s26 + $0x108] sm:$0xff] %v285_v33   ;;  %v297_v36 = vld [vmem:[%s2843_s25 + $0x1f0] sm:$0xff]  }
  0x24   : > { %290 = vst [vmem:[%s2848_s26 + $0x110] sm:$0xff] %v289_v34   ;;  %294 = vst [vmem:[%s2848_s26 + $0x118] sm:$0xff] %v293_v35   ;;  %v301_v37 = vld [vmem:[%s2843_s25 + $0x1f8] sm:$0xff]   ;;  %v305_v38 = vld [vmem:[%s2843_s25 + $0x200] sm:$0xff]  }
  0x25   : > { %298 = vst [vmem:[%s2848_s26 + $0x120] sm:$0xff] %v297_v36   ;;  %302 = vst [vmem:[%s2848_s26 + $0x128] sm:$0xff] %v301_v37   ;;  %v309_v39 = vld [vmem:[%s2843_s25 + $0x270] sm:$0xff]   ;;  %v313_v40 = vld [vmem:[%s2843_s25 + $0x278] sm:$0xff]  }
  0x26   : > { %306 = vst [vmem:[%s2848_s26 + $0x130] sm:$0xff] %v305_v38   ;;  %v317_v41 = vld [vmem:[%s2843_s25 + $0x280] sm:$0xff]   ;;  %310 = vst [vmem:[%s2848_s26 + $0x138] sm:$0xff] %v309_v39   ;;  %v321_v42 = vld [vmem:[%s2843_s25 + $0x288] sm:$0xff]  }
  0x27   : > { %314 = vst [vmem:[%s2848_s26 + $0x140] sm:$0xff] %v313_v40   ;;  %318 = vst [vmem:[%s2848_s26 + $0x148] sm:$0xff] %v317_v41   ;;  %v325_v43 = vld [vmem:[%s2843_s25 + $0x290] sm:$0xff]   ;;  %v329_v44 = vld [vmem:[%s2843_s25 + $0x298] sm:$0xff]  }
  0x28   : > { %322 = vst [vmem:[%s2848_s26 + $0x150] sm:$0xff] %v321_v42   ;;  %326 = vst [vmem:[%s2848_s26 + $0x158] sm:$0xff] %v325_v43   ;;  %v333_v45 = vld [vmem:[%s2843_s25 + $0x2a0] sm:$0xff]   ;;  %v337_v46 = vld [vmem:[%s2843_s25 + $0x2a8] sm:$0xff]  }
  0x29   : > { %330 = vst [vmem:[%s2848_s26 + $0x160] sm:$0xff] %v329_v44   ;;  %v341_v47 = vld [vmem:[%s2843_s25 + $0x2b0] sm:$0xff]   ;;  %334 = vst [vmem:[%s2848_s26 + $0x168] sm:$0xff] %v333_v45   ;;  %v345_v48 = vld [vmem:[%s2843_s25 + $0x2b8] sm:$0xff]  }
  0x2a   : > { %338 = vst [vmem:[%s2848_s26 + $0x170] sm:$0xff] %v337_v46   ;;  %342 = vst [vmem:[%s2848_s26 + $0x178] sm:$0xff] %v341_v47   ;;  %v349_v49 = vld [vmem:[%s2843_s25 + $0x2c0] sm:$0xff]   ;;  %v353_v50 = vld [vmem:[%s2843_s25 + $0x2c8] sm:$0xff]  }
  0x2b   : > { %346 = vst [vmem:[%s2848_s26 + $0x180] sm:$0xff] %v345_v48   ;;  %350 = vst [vmem:[%s2848_s26 + $0x188] sm:$0xff] %v349_v49   ;;  %v357_v51 = vld [vmem:[%s2843_s25 + $0x2d0] sm:$0xff]  }
  0x2c   : > { %354 = vst [vmem:[%s2848_s26 + $0x190] sm:$0xff] %v353_v50   ;;  %358 = vst [vmem:[%s2848_s26 + $0x198] sm:$0xff] %v357_v51  }
  0x2d PF: > { %p2045_p5 = scmp.ge.s32.totalorder %s2785_s14, 1  ;;  %p590_p6 = scmp.lt.s32.totalorder %s2785_s14, 3 }
  0x2f   : > { %p591_p7 = pnand %p2045_p5, %p590_p6 }
  0x30   : > { %v2702_v52 = vld [vmem:[%s3387_s1] sm:$0xff] (!%p591_p7)   ;;  %v2787_v53 = vmov (!%p591_p7), 0.0   ;;  %v2703_v54 = vld [vmem:[%s3387_s1 + $0x8] sm:$0xff] (!%p591_p7)   ;;  %s597_s4 = sand.u32 (!%p591_p7), 1, %s2777_s12   ;;  %vm2788_vm0 = vmmov (!%p591_p7), 0   ;;  %v2704_v55 = vld [vmem:[%s3387_s1 + $0x10] sm:$0xff] (!%p591_p7)  }
  0x31   : > { %594 = sbr.rel (%p591_p7) target bundleno = 506 (0x1fa), region = 69  ;;  %2402 = vmatprep.subr.bf16.mxu0 (!%p591_p7), %v2787_v53  ;;  %2470 = vmatprep.subr.bf16.mxu1 (!%p591_p7), %v2787_v53  ;;  %v2705_v56 = vld [vmem:[%s3387_s1 + $0x18] sm:$0xff] (!%p591_p7)   ;;  %v2706_v57 = vld [vmem:[%s3387_s1 + $0x20] sm:$0xff] (!%p591_p7)   ;;  %v2707_v58 = vld [vmem:[%s3387_s1 + $0x28] sm:$0xff] (!%p591_p7)  }
  0x32   : > { %2403 = vmatpush3.bf16.msra.mxu0 (!%p591_p7), %v2702_v52  ;;  %2471 = vmatpush3.bf16.msra.mxu1 (!%p591_p7), %v2702_v52  ;;  %s2675_s5 = smul.u32 (!%p591_p7), 416, %s597_s4  ;;  %v2708_v59 = vld [vmem:[%s3387_s1 + $0x30] sm:$0xff] (!%p591_p7)   ;;  %v2709_v60 = vld [vmem:[%s3387_s1 + $0x38] sm:$0xff] (!%p591_p7)   ;;  %v3171_v49 = vld [vmem:[%s3388_s2] ss:$0 sm:$0xff] (!%p591_p7) }
  0x33   : > { %2404 = vmatprep.subr.bf16.mxu0 (!%p591_p7), %v2787_v53  ;;  %2472 = vmatprep.subr.bf16.mxu1 (!%p591_p7), %v2787_v53  ;;  %s621_s26 = smul.u32 (!%p591_p7), 26, %s2040_s15 }
  0x34   : > { %2418 = vmatprep.mubr.msk.bf16.mxu0 (!%p591_p7), %vm2788_vm0, %v2787_v53  ;;  %2486 = vmatprep.mubr.msk.bf16.mxu1 (!%p591_p7), %vm2788_vm0, %v2787_v53  ;;  %s2973_s8 = scalar_lea.vmem (!%p591_p7), [#allocation2], %s2675_s5 }
  0x35   : > { %v2710_v61 = vld [vmem:[%s2973_s8] sm:$0xff] (!%p591_p7)   ;;  %v2711_v62 = vld [vmem:[%s2973_s8 + $0x68] sm:$0xff] (!%p591_p7)   ;;  %v2713_v0 = vld [vmem:[%s2973_s8 + $0x70] sm:$0xff] (!%p591_p7)   ;;  %p622_p8 = scmp.lt.s32.totalorder (!%p591_p7), %s621_s26, 51 }
  0x36   : > { %2405 = vmatpush3.bf16.msra.mxu0 (!%p591_p7), %v2703_v54  ;;  %2473 = vmatpush3.bf16.msra.mxu1 (!%p591_p7), %v2703_v54  ;;  %v2712_v63 = vld [vmem:[%s2973_s8 + $0x8] sm:$0xff] (!%p591_p7)   ;;  %v2714_v1 = vld [vmem:[%s2973_s8 + $0x10] sm:$0xff] (!%p591_p7)   ;;  %v2715_v2 = vld [vmem:[%s2973_s8 + $0x78] sm:$0xff] (!%p591_p7)  }
  0x37   : > { %2406 = vmatprep.subr.bf16.mxu0 (!%p591_p7), %v2787_v53  ;;  %2474 = vmatprep.subr.bf16.mxu1 (!%p591_p7), %v2787_v53  ;;  %v2716_v3 = vld [vmem:[%s2973_s8 + $0x18] sm:$0xff] (!%p591_p7)   ;;  %v2717_v4 = vld [vmem:[%s2973_s8 + $0x80] sm:$0xff] (!%p591_p7)   ;;  %v2719_v6 = vld [vmem:[%s2973_s8 + $0x88] sm:$0xff] (!%p591_p7)  }
  0x38   : > { %v2718_v5 = vld [vmem:[%s2973_s8 + $0x20] sm:$0xff]   ;;  %v2720_v7 = vld [vmem:[%s2973_s8 + $0x28] sm:$0xff]   ;;  %v2721_v8 = vld [vmem:[%s2973_s8 + $0x90] sm:$0xff]   ;;  %s3394_s26 = smov (!%p622_p8, %s621_s26), 51 }
  0x39   : > { %v2722_v9 = vld [vmem:[%s2973_s8 + $0x30] sm:$0xff]   ;;  %v2723_v10 = vld [vmem:[%s2973_s8 + $0x98] sm:$0xff]   ;;  %v2725_v12 = vld [vmem:[%s2973_s8 + $0xa0] sm:$0xff]   ;;  %s2046_s14 = sshll.u32 %s3394_s26, 2 }
  0x3a   : > { %2407 = vmatpush3.bf16.msra.mxu0 %v2704_v55  ;;  %2475 = vmatpush3.bf16.msra.mxu1 %v2704_v55  ;;  %v2724_v11 = vld [vmem:[%s2973_s8 + $0x38] sm:$0xff]   ;;  %v2726_v13 = vld [vmem:[%s2973_s8 + $0x40] sm:$0xff]   ;;  %v2727_v14 = vld [vmem:[%s2973_s8 + $0xa8] sm:$0xff]   ;;  %s3290_s28 = scalar_lea.vmem %s3389_s3, %s2046_s14 }
  0x3b   : > { %2408 = vmatprep.subr.bf16.mxu0 %v2787_v53  ;;  %2476 = vmatprep.subr.bf16.mxu1 %v2787_v53  ;;  %v2728_v15 = vld [vmem:[%s2973_s8 + $0x48] sm:$0xff]   ;;  %v2729_v16 = vld [vmem:[%s2973_s8 + $0xb0] sm:$0xff]   ;;  %v2731_v18 = vld [vmem:[%s2973_s8 + $0xb8] sm:$0xff]  }
  0x3c   : > { %v2730_v17 = vld [vmem:[%s2973_s8 + $0x50] sm:$0xff]   ;;  %v2732_v19 = vld [vmem:[%s2973_s8 + $0x58] sm:$0xff]   ;;  %v2733_v20 = vld [vmem:[%s2973_s8 + $0xc0] sm:$0xff]  }
  0x3d   : > { %v2734_v21 = vld [vmem:[%s2973_s8 + $0x60] sm:$0xff]   ;;  %v2735_v22 = vld [vmem:[%s2973_s8 + $0xc8] sm:$0xff]   ;;  %v2736_v23 = vld [vmem:[%s2973_s8 + $0xd0] sm:$0xff]  }
  0x3e   : > { %2409 = vmatpush3.bf16.msra.mxu0 %v2705_v56  ;;  %2477 = vmatpush3.bf16.msra.mxu1 %v2705_v56  ;;  %v2737_v24 = vld [vmem:[%s2973_s8 + $0x138] sm:$0xff]   ;;  %v2739_v26 = vld [vmem:[%s2973_s8 + $0x140] sm:$0xff]   ;;  %v2741_v28 = vld [vmem:[%s2973_s8 + $0x148] sm:$0xff]  }
  0x3f   : > { %2410 = vmatprep.subr.bf16.mxu0 %v2787_v53  ;;  %2478 = vmatprep.subr.bf16.mxu1 %v2787_v53  ;;  %v2738_v25 = vld [vmem:[%s2973_s8 + $0xd8] sm:$0xff]   ;;  %v2740_v27 = vld [vmem:[%s2973_s8 + $0xe0] sm:$0xff]   ;;  %v2742_v29 = vld [vmem:[%s2973_s8 + $0xe8] sm:$0xff]  }
  0x40   : > { %v2743_v30 = vld [vmem:[%s2973_s8 + $0x150] sm:$0xff]   ;;  %v2745_v32 = vld [vmem:[%s2973_s8 + $0x158] sm:$0xff]   ;;  %v2747_v34 = vld [vmem:[%s2973_s8 + $0x160] sm:$0xff]  }
  0x41   : > { %v2744_v31 = vld [vmem:[%s2973_s8 + $0xf0] sm:$0xff]   ;;  %v2746_v33 = vld [vmem:[%s2973_s8 + $0xf8] sm:$0xff]   ;;  %v2748_v35 = vld [vmem:[%s2973_s8 + $0x100] sm:$0xff]  }
  0x42   : > { %2411 = vmatpush3.bf16.msra.mxu0 %v2706_v57  ;;  %2479 = vmatpush3.bf16.msra.mxu1 %v2706_v57  ;;  %v2749_v36 = vld [vmem:[%s2973_s8 + $0x168] sm:$0xff]   ;;  %v2751_v38 = vld [vmem:[%s2973_s8 + $0x170] sm:$0xff]   ;;  %v2753_v40 = vld [vmem:[%s2973_s8 + $0x178] sm:$0xff]  }
  0x43   : > { %2412 = vmatprep.subr.bf16.mxu0 %v2787_v53  ;;  %2480 = vmatprep.subr.bf16.mxu1 %v2787_v53  ;;  %v2750_v37 = vld [vmem:[%s2973_s8 + $0x108] sm:$0xff]   ;;  %v2752_v39 = vld [vmem:[%s2973_s8 + $0x110] sm:$0xff]   ;;  %v2754_v41 = vld [vmem:[%s2973_s8 + $0x118] sm:$0xff]  }
  0x44   : > { %v2755_v42 = vld [vmem:[%s2973_s8 + $0x180] sm:$0xff]   ;;  %v2757_v44 = vld [vmem:[%s2973_s8 + $0x188] sm:$0xff]   ;;  %v2759_v46 = vld [vmem:[%s2973_s8 + $0x190] sm:$0xff]  }
  0x45   : > { %v2756_v43 = vld [vmem:[%s2973_s8 + $0x120] sm:$0xff]   ;;  %v2758_v45 = vld [vmem:[%s2973_s8 + $0x128] sm:$0xff]   ;;  %v2760_v47 = vld [vmem:[%s2973_s8 + $0x130] sm:$0xff]  }
  0x46   : > { %2413 = vmatpush3.bf16.msra.mxu0 %v2707_v58  ;;  %2481 = vmatpush3.bf16.msra.mxu1 %v2707_v58  ;;  %v2761_v48 = vld [vmem:[%s2973_s8 + $0x198] sm:$0xff]  }
  0x47   : > { %2414 = vmatprep.subr.bf16.mxu0 %v2787_v53  ;;  %2482 = vmatprep.subr.bf16.mxu1 %v2787_v53 }
  0x4a   : > { %2415 = vmatpush3.bf16.msra.mxu0 %v2708_v59  ;;  %2483 = vmatpush3.bf16.msra.mxu1 %v2708_v59 }
  0x4b   : > { %2416 = vmatprep.subr.bf16.mxu0 %v2787_v53  ;;  %2484 = vmatprep.subr.bf16.mxu1 %v2787_v53 }
  0x4e   : > { %2417 = vmatpush3.bf16.msra.mxu0 %v2709_v60  ;;  %2485 = vmatpush3.bf16.msra.mxu1 %v2709_v60 }
  0x4f   : > { %2538 = vmatprep.subr.bf16.mxu0 %v2787_v53  ;;  %2606 = vmatprep.subr.bf16.mxu1 %v2787_v53 }
  0x51   : > { %2419 = vmatmul.mubr.bf16.vlgmr.msra.gmra.mrb[0].mxu0 %v2710_v61  ;;  %2487 = vmatmul.mubr.bf16.vlgmr.msra.gmra.mrb[0].mxu1 %v2711_v62 }
  0x52   : > { %2539 = vmatpush3.bf16.msra.mxu0 %v2702_v52  ;;  %2607 = vmatpush3.bf16.msra.mxu1 %v2702_v52 }
  0x53   : > { %2422 = vmatprep.mubr.msk.bf16.mxu0 %vm2788_vm0, %v2787_v53  ;;  %2490 = vmatprep.mubr.msk.bf16.mxu1 %vm2788_vm0, %v2787_v53 }
  0x54   : > { %2540 = vmatprep.subr.bf16.mxu0 %v2787_v53  ;;  %2608 = vmatprep.subr.bf16.mxu1 %v2787_v53 }
  0x56   : > { %2541 = vmatpush3.bf16.msra.mxu0 %v2703_v54  ;;  %2609 = vmatpush3.bf16.msra.mxu1 %v2703_v54 }
  0x57   : > { %2542 = vmatprep.subr.bf16.mxu0 %v2787_v53  ;;  %2610 = vmatprep.subr.bf16.mxu1 %v2787_v53 }
  0x59   : > { %2423 = vmatmul.mubr.bf16.gmra.mrb[4].mxu0 %v2712_v63  ;;  %2491 = vmatmul.mubr.bf16.gmra.mrb[4].mxu1 %v2713_v0 }
  0x5a   : > { %2426 = vmatprep.mubr.msk.bf16.mxu0 %vm2788_vm0, %v2787_v53  ;;  %2494 = vmatprep.mubr.msk.bf16.mxu1 %vm2788_vm0, %v2787_v53 }
  0x5b   : > { %2543 = vmatpush3.bf16.msra.mxu0 %v2704_v55  ;;  %2611 = vmatpush3.bf16.msra.mxu1 %v2704_v55 }
  0x5c   : > { %2544 = vmatprep.subr.bf16.mxu0 %v2787_v53  ;;  %2612 = vmatprep.subr.bf16.mxu1 %v2787_v53 }
  0x5f   : > { %2545 = vmatpush3.bf16.msra.mxu0 %v2705_v56  ;;  %2613 = vmatpush3.bf16.msra.mxu1 %v2705_v56 }
  0x60   : > { %2546 = vmatprep.subr.bf16.mxu0 %v2787_v53  ;;  %2614 = vmatprep.subr.bf16.mxu1 %v2787_v53 }
  0x61   : > { %2427 = vmatmul.mubr.bf16.gmra.mrb[8].mxu0 %v2714_v1  ;;  %2495 = vmatmul.mubr.bf16.gmra.mrb[8].mxu1 %v2715_v2 }
  0x62   : > { %2430 = vmatprep.mubr.msk.bf16.mxu0 %vm2788_vm0, %v2787_v53  ;;  %2498 = vmatprep.mubr.msk.bf16.mxu1 %vm2788_vm0, %v2787_v53 }
  0x63   : > { %2547 = vmatpush3.bf16.msra.mxu0 %v2706_v57  ;;  %2615 = vmatpush3.bf16.msra.mxu1 %v2706_v57 }
  0x64   : > { %2548 = vmatprep.subr.bf16.mxu0 %v2787_v53  ;;  %2616 = vmatprep.subr.bf16.mxu1 %v2787_v53 }
  0x67   : > { %2549 = vmatpush3.bf16.msra.mxu0 %v2707_v58  ;;  %2617 = vmatpush3.bf16.msra.mxu1 %v2707_v58 }
  0x68   : > { %2550 = vmatprep.subr.bf16.mxu0 %v2787_v53  ;;  %2618 = vmatprep.subr.bf16.mxu1 %v2787_v53 }
  0x69   : > { %2431 = vmatmul.mubr.bf16.gmra.mrb[12].mxu0 %v2716_v3  ;;  %2499 = vmatmul.mubr.bf16.gmra.mrb[12].mxu1 %v2717_v4 }
  0x6a   : > { %2434 = vmatprep.mubr.msk.bf16.mxu0 %vm2788_vm0, %v2787_v53  ;;  %2502 = vmatprep.mubr.msk.bf16.mxu1 %vm2788_vm0, %v2787_v53 }
  0x6b   : > { %2551 = vmatpush3.bf16.msra.mxu0 %v2708_v59  ;;  %2619 = vmatpush3.bf16.msra.mxu1 %v2708_v59 }
  0x6c   : > { %2552 = vmatprep.subr.bf16.mxu0 %v2787_v53  ;;  %2620 = vmatprep.subr.bf16.mxu1 %v2787_v53 }
  0x6f   : > { %2553 = vmatpush3.bf16.msra.mxu0 %v2709_v60  ;;  %2621 = vmatpush3.bf16.msra.mxu1 %v2709_v60 }
  0x71   : > { %2435 = vmatmul.mubr.bf16.gmra.mrb[16].mxu0 %v2718_v5  ;;  %2503 = vmatmul.mubr.bf16.gmra.mrb[16].mxu1 %v2719_v6 }
  0x72   : > { %2438 = vmatprep.mubr.msk.bf16.mxu0 %vm2788_vm0, %v2787_v53  ;;  %2506 = vmatprep.mubr.msk.bf16.mxu1 %vm2788_vm0, %v2787_v53 }
  0x79   : > { %2439 = vmatmul.mubr.bf16.gmra.mrb[20].mxu0 %v2720_v7  ;;  %2507 = vmatmul.mubr.bf16.gmra.mrb[20].mxu1 %v2721_v8 }
  0x7a   : > { %2442 = vmatprep.mubr.msk.bf16.mxu0 %vm2788_vm0, %v2787_v53  ;;  %2510 = vmatprep.mubr.msk.bf16.mxu1 %vm2788_vm0, %v2787_v53 }
  0x81   : > { %2443 = vmatmul.mubr.bf16.gmra.mrb[24].mxu0 %v2722_v9  ;;  %2511 = vmatmul.mubr.bf16.gmra.mrb[24].mxu1 %v2723_v10 }
  0x82   : > { %2446 = vmatprep.mubr.msk.bf16.mxu0 %vm2788_vm0, %v2787_v53  ;;  %2514 = vmatprep.mubr.msk.bf16.mxu1 %vm2788_vm0, %v2787_v53 }
  0x89   : > { %2447 = vmatmul.mubr.bf16.gmra.mrb[28].mxu0 %v2724_v11  ;;  %2515 = vmatmul.mubr.bf16.gmra.mrb[28].mxu1 %v2725_v12 }
  0x8a   : > { %2450 = vmatprep.mubr.msk.bf16.mxu0 %vm2788_vm0, %v2787_v53  ;;  %2518 = vmatprep.mubr.msk.bf16.mxu1 %vm2788_vm0, %v2787_v53 }
  0x91   : > { %2451 = vmatmul.mubr.bf16.gmra.mrb[32].mxu0 %v2726_v13  ;;  %2519 = vmatmul.mubr.bf16.gmra.mrb[32].mxu1 %v2727_v14 }
  0x92   : > { %2454 = vmatprep.mubr.msk.bf16.mxu0 %vm2788_vm0, %v2787_v53  ;;  %2522 = vmatprep.mubr.msk.bf16.mxu1 %vm2788_vm0, %v2787_v53 }
  0x99   : > { %2455 = vmatmul.mubr.bf16.gmra.mrb[36].mxu0 %v2728_v15  ;;  %2523 = vmatmul.mubr.bf16.gmra.mrb[36].mxu1 %v2729_v16 }
  0x9a   : > { %2458 = vmatprep.mubr.msk.bf16.mxu0 %vm2788_vm0, %v2787_v53  ;;  %2526 = vmatprep.mubr.msk.bf16.mxu1 %vm2788_vm0, %v2787_v53 }
  0xa1   : > { %2459 = vmatmul.mubr.bf16.gmra.mrb[40].mxu0 %v2730_v17  ;;  %2527 = vmatmul.mubr.bf16.gmra.mrb[40].mxu1 %v2731_v18 }
  0xa2   : > { %2462 = vmatprep.mubr.msk.bf16.mxu0 %vm2788_vm0, %v2787_v53  ;;  %2530 = vmatprep.mubr.msk.bf16.mxu1 %vm2788_vm0, %v2787_v53 }
  0xa9   : > { %2463 = vmatmul.mubr.bf16.gmra.mrb[44].mxu0 %v2732_v19  ;;  %2531 = vmatmul.mubr.bf16.gmra.mrb[44].mxu1 %v2733_v20 }
  0xaa   : > { %2466 = vmatprep.mubr.msk.bf16.mxu0 %vm2788_vm0, %v2787_v53  ;;  %2534 = vmatprep.mubr.msk.bf16.mxu1 %vm2788_vm0, %v2787_v53 }
  0xb1   : > { %2467 = vmatmul.mubr.bf16.gmra.mrb[48].mxu0 %v2734_v21  ;;  %2535 = vmatmul.mubr.bf16.gmra.mrb[48].mxu1 %v2735_v22 }
  0xb2   : > { %2554 = vmatprep.mubr.msk.bf16.mxu0 %vm2788_vm0, %v2787_v53  ;;  %2622 = vmatprep.mubr.msk.bf16.mxu1 %vm2788_vm0, %v2787_v53 }
  0xb9   : > { %2555 = vmatmul.mubr.bf16.vlgmr.msra.gmra.mrb[52].mxu0 %v2736_v23  ;;  %2623 = vmatmul.mubr.bf16.vlgmr.msra.gmra.mrb[52].mxu1 %v2737_v24 }
  0xba   : > { %2558 = vmatprep.mubr.msk.bf16.mxu0 %vm2788_vm0, %v2787_v53  ;;  %2626 = vmatprep.mubr.msk.bf16.mxu1 %vm2788_vm0, %v2787_v53 }
  0xc1   : > { %2559 = vmatmul.mubr.bf16.gmra.mrb[56].mxu0 %v2738_v25  ;;  %2627 = vmatmul.mubr.bf16.gmra.mrb[56].mxu1 %v2739_v26 }
  0xc2   : > { %2562 = vmatprep.mubr.msk.bf16.mxu0 %vm2788_vm0, %v2787_v53  ;;  %2630 = vmatprep.mubr.msk.bf16.mxu1 %vm2788_vm0, %v2787_v53 }
  0xc9   : > { %2563 = vmatmul.mubr.bf16.gmra.mrb[60].mxu0 %v2740_v27  ;;  %2631 = vmatmul.mubr.bf16.gmra.mrb[60].mxu1 %v2741_v28 }
  0xca   : > { %2566 = vmatprep.mubr.msk.bf16.mxu0 %vm2788_vm0, %v2787_v53  ;;  %2634 = vmatprep.mubr.msk.bf16.mxu1 %vm2788_vm0, %v2787_v53 }
  0xd1   : > { %2567 = vmatmul.mubr.bf16.gmra.mrb[64].mxu0 %v2742_v29  ;;  %2635 = vmatmul.mubr.bf16.gmra.mrb[64].mxu1 %v2743_v30 }
  0xd2   : > { %2570 = vmatprep.mubr.msk.bf16.mxu0 %vm2788_vm0, %v2787_v53  ;;  %2638 = vmatprep.mubr.msk.bf16.mxu1 %vm2788_vm0, %v2787_v53 }
  0xd9   : > { %2571 = vmatmul.mubr.bf16.gmra.mrb[68].mxu0 %v2744_v31  ;;  %2639 = vmatmul.mubr.bf16.gmra.mrb[68].mxu1 %v2745_v32 }
  0xda   : > { %2574 = vmatprep.mubr.msk.bf16.mxu0 %vm2788_vm0, %v2787_v53  ;;  %2642 = vmatprep.mubr.msk.bf16.mxu1 %vm2788_vm0, %v2787_v53 }
  0xe1   : > { %2575 = vmatmul.mubr.bf16.gmra.mrb[72].mxu0 %v2746_v33  ;;  %2643 = vmatmul.mubr.bf16.gmra.mrb[72].mxu1 %v2747_v34 }
  0xe2   : > { %2578 = vmatprep.mubr.msk.bf16.mxu0 %vm2788_vm0, %v2787_v53  ;;  %2646 = vmatprep.mubr.msk.bf16.mxu1 %vm2788_vm0, %v2787_v53 }
  0xe9   : > { %2579 = vmatmul.mubr.bf16.gmra.mrb[76].mxu0 %v2748_v35  ;;  %2647 = vmatmul.mubr.bf16.gmra.mrb[76].mxu1 %v2749_v36 }
  0xea   : > { %2582 = vmatprep.mubr.msk.bf16.mxu0 %vm2788_vm0, %v2787_v53  ;;  %2650 = vmatprep.mubr.msk.bf16.mxu1 %vm2788_vm0, %v2787_v53 }
  0xf1   : > { %2583 = vmatmul.mubr.bf16.gmra.mrb[80].mxu0 %v2750_v37  ;;  %2651 = vmatmul.mubr.bf16.gmra.mrb[80].mxu1 %v2751_v38 }
  0xf2   : > { %2586 = vmatprep.mubr.msk.bf16.mxu0 %vm2788_vm0, %v2787_v53  ;;  %2654 = vmatprep.mubr.msk.bf16.mxu1 %vm2788_vm0, %v2787_v53 }
  0xf9   : > { %2587 = vmatmul.mubr.bf16.gmra.mrb[84].mxu0 %v2752_v39  ;;  %2655 = vmatmul.mubr.bf16.gmra.mrb[84].mxu1 %v2753_v40 }
  0xfa   : > { %2590 = vmatprep.mubr.msk.bf16.mxu0 %vm2788_vm0, %v2787_v53  ;;  %2658 = vmatprep.mubr.msk.bf16.mxu1 %vm2788_vm0, %v2787_v53 }
 0x101   : > { %2591 = vmatmul.mubr.bf16.gmra.mrb[88].mxu0 %v2754_v41  ;;  %2659 = vmatmul.mubr.bf16.gmra.mrb[88].mxu1 %v2755_v42 }
 0x102   : > { %2594 = vmatprep.mubr.msk.bf16.mxu0 %vm2788_vm0, %v2787_v53  ;;  %2662 = vmatprep.mubr.msk.bf16.mxu1 %vm2788_vm0, %v2787_v53 }
 0x109   : > { %2595 = vmatmul.mubr.bf16.gmra.mrb[92].mxu0 %v2756_v43  ;;  %2663 = vmatmul.mubr.bf16.gmra.mrb[92].mxu1 %v2757_v44 }
 0x10a   : > { %2598 = vmatprep.mubr.msk.bf16.mxu0 %vm2788_vm0, %v2787_v53  ;;  %2666 = vmatprep.mubr.msk.bf16.mxu1 %vm2788_vm0, %v2787_v53 }
 0x111   : > { %2599 = vmatmul.mubr.bf16.gmra.mrb[96].mxu0 %v2758_v45  ;;  %2667 = vmatmul.mubr.bf16.gmra.mrb[96].mxu1 %v2759_v46 }
 0x112   : > { %2602 = vmatprep.mubr.msk.bf16.mxu0 %vm2788_vm0, %v2787_v53  ;;  %2670 = vmatprep.mubr.msk.bf16.mxu1 %vm2788_vm0, %v2787_v53 }
 0x119   : > { %2603 = vmatmul.mubr.bf16.gmra.mrb[100].mxu0 %v2760_v47  ;;  %2671 = vmatmul.mubr.bf16.gmra.mrb[100].mxu1 %v2761_v48 }
 0x124   : > { %v837_v50 = vpop.f32.mrb[0].mxu0  ;;  %v1105_v51 = vpop.f32.mrb[0].mxu1 }
 0x125   : > { %v838_v52 = vadd.f32 %v3171_v49, %v837_v50  ;;  %v1106_v54 = vadd.f32 %v3171_v49, %v1105_v51  ;;  %v2420_v55 = vpop.f32.mrb[1].mxu0  ;;  %v2488_v56 = vpop.f32.mrb[1].mxu1 }
 0x126   : > { %v840_v57 = vpop.f32.mrb[2].mxu0  ;;  %v1108_v58 = vpop.f32.mrb[2].mxu1 }
 0x127   : > { %v940_v53 = vmax.f32 %v838_v52, 0.0  ;;  %v1208_v59 = vmax.f32 %v1106_v54, 0.0  ;;  %v841_v60 = vadd.f32 %v3171_v49, %v840_v57  ;;  %v1109_v61 = vadd.f32 %v3171_v49, %v1108_v58  ;;  %v2421_v62 = vpop.f32.mrb[3].mxu0  ;;  %v2489_v63 = vpop.f32.mrb[3].mxu1 }
 0x129   : > { %v3177_v0 = vmax.f32 %v940_v53, %v1208_v59  ;;  %v941_v1 = vmax.f32 %v841_v60, 0.0  ;;  %v1209_v2 = vmax.f32 %v1109_v61, 0.0 }
 0x12b   : > { %v3179_v3 = vmax.f32 %v941_v1, %v1209_v2 }
 0x12c   : > { %v845_v4 = vpop.f32.mrb[4].mxu0  ;;  %v1113_v5 = vpop.f32.mrb[4].mxu1 }
 0x12d   : > { %v846_v6 = vadd.f32 %v3171_v49, %v845_v4  ;;  %v1114_v7 = vadd.f32 %v3171_v49, %v1113_v5  ;;  %v2424_v8 = vpop.f32.mrb[5].mxu0  ;;  %v2492_v9 = vpop.f32.mrb[5].mxu1 }
 0x12e   : > { %v848_v10 = vpop.f32.mrb[6].mxu0  ;;  %v1116_v11 = vpop.f32.mrb[6].mxu1 }
 0x12f   : > { %v942_v12 = vmax.f32 %v846_v6, 0.0  ;;  %v1210_v13 = vmax.f32 %v1114_v7, 0.0  ;;  %v849_v14 = vadd.f32 %v3171_v49, %v848_v10  ;;  %v1117_v15 = vadd.f32 %v3171_v49, %v1116_v11  ;;  %v2425_v16 = vpop.f32.mrb[7].mxu0  ;;  %v2493_v17 = vpop.f32.mrb[7].mxu1 }
 0x131   : > { %v3185_v18 = vmax.f32 %v942_v12, %v1210_v13  ;;  %v943_v19 = vmax.f32 %v849_v14, 0.0  ;;  %v1211_v20 = vmax.f32 %v1117_v15, 0.0 }
 0x133   : > { %v3187_v21 = vmax.f32 %v943_v19, %v1211_v20 }
 0x134   : > { %v853_v22 = vpop.f32.mrb[8].mxu0  ;;  %v1121_v23 = vpop.f32.mrb[8].mxu1 }
 0x135   : > { %v854_v24 = vadd.f32 %v3171_v49, %v853_v22  ;;  %v1122_v25 = vadd.f32 %v3171_v49, %v1121_v23  ;;  %v2428_v26 = vpop.f32.mrb[9].mxu0  ;;  %v2496_v27 = vpop.f32.mrb[9].mxu1 }
 0x136   : > { %v856_v28 = vpop.f32.mrb[10].mxu0  ;;  %v1124_v29 = vpop.f32.mrb[10].mxu1 }
 0x137   : > { %v944_v30 = vmax.f32 %v854_v24, 0.0  ;;  %v1212_v31 = vmax.f32 %v1122_v25, 0.0  ;;  %v857_v32 = vadd.f32 %v3171_v49, %v856_v28  ;;  %v1125_v33 = vadd.f32 %v3171_v49, %v1124_v29  ;;  %v2429_v34 = vpop.f32.mrb[11].mxu0  ;;  %v2497_v35 = vpop.f32.mrb[11].mxu1 }
 0x139   : > { %v3193_v36 = vmax.f32 %v944_v30, %v1212_v31  ;;  %v945_v37 = vmax.f32 %v857_v32, 0.0  ;;  %v1213_v38 = vmax.f32 %v1125_v33, 0.0 }
 0x13b   : > { %v3195_v39 = vmax.f32 %v945_v37, %v1213_v38 }
 0x13c   : > { %v861_v40 = vpop.f32.mrb[12].mxu0  ;;  %v1129_v41 = vpop.f32.mrb[12].mxu1 }
 0x13d   : > { %v862_v42 = vadd.f32 %v3171_v49, %v861_v40  ;;  %v1130_v43 = vadd.f32 %v3171_v49, %v1129_v41  ;;  %v2432_v44 = vpop.f32.mrb[13].mxu0  ;;  %v2500_v45 = vpop.f32.mrb[13].mxu1 }
 0x13e   : > { %v864_v46 = vpop.f32.mrb[14].mxu0  ;;  %v1132_v47 = vpop.f32.mrb[14].mxu1 }
 0x13f   : > { %v946_v48 = vmax.f32 %v862_v42, 0.0  ;;  %v1214_v50 = vmax.f32 %v1130_v43, 0.0  ;;  %v865_v51 = vadd.f32 %v3171_v49, %v864_v46  ;;  %v1133_v52 = vadd.f32 %v3171_v49, %v1132_v47  ;;  %v2433_v54 = vpop.f32.mrb[15].mxu0  ;;  %v2501_v55 = vpop.f32.mrb[15].mxu1 }
 0x141   : > { %v3201_v56 = vmax.f32 %v946_v48, %v1214_v50  ;;  %v947_v57 = vmax.f32 %v865_v51, 0.0  ;;  %v1215_v58 = vmax.f32 %v1133_v52, 0.0 }
 0x143   : > { %v3203_v53 = vmax.f32 %v947_v57, %v1215_v58 }
 0x144   : > { %v869_v59 = vpop.f32.mrb[16].mxu0  ;;  %v1137_v60 = vpop.f32.mrb[16].mxu1 }
 0x145   : > { %v870_v61 = vadd.f32 %v3171_v49, %v869_v59  ;;  %v1138_v62 = vadd.f32 %v3171_v49, %v1137_v60  ;;  %v2436_v63 = vpop.f32.mrb[17].mxu0  ;;  %v2504_v1 = vpop.f32.mrb[17].mxu1 }
 0x146   : > { %v872_v2 = vpop.f32.mrb[18].mxu0  ;;  %v1140_v4 = vpop.f32.mrb[18].mxu1 }
 0x147   : > { %v948_v5 = vmax.f32 %v870_v61, 0.0  ;;  %v1216_v6 = vmax.f32 %v1138_v62, 0.0  ;;  %v873_v7 = vadd.f32 %v3171_v49, %v872_v2  ;;  %v1141_v8 = vadd.f32 %v3171_v49, %v1140_v4  ;;  %v2437_v9 = vpop.f32.mrb[19].mxu0  ;;  %v2505_v10 = vpop.f32.mrb[19].mxu1 }
 0x149   : > { %v3209_v11 = vmax.f32 %v948_v5, %v1216_v6  ;;  %v949_v12 = vmax.f32 %v873_v7, 0.0  ;;  %v1217_v13 = vmax.f32 %v1141_v8, 0.0 }
 0x14b   : > { %v3211_v14 = vmax.f32 %v949_v12, %v1217_v13 }
 0x14c   : > { %v877_v15 = vpop.f32.mrb[20].mxu0  ;;  %v1145_v16 = vpop.f32.mrb[20].mxu1 }
 0x14d   : > { %v878_v17 = vadd.f32 %v3171_v49, %v877_v15  ;;  %v1146_v19 = vadd.f32 %v3171_v49, %v1145_v16  ;;  %v2440_v20 = vpop.f32.mrb[21].mxu0  ;;  %v2508_v22 = vpop.f32.mrb[21].mxu1 }
 0x14e   : > { %v880_v23 = vpop.f32.mrb[22].mxu0  ;;  %v1148_v24 = vpop.f32.mrb[22].mxu1 }
 0x14f   : > { %v950_v25 = vmax.f32 %v878_v17, 0.0  ;;  %v1218_v26 = vmax.f32 %v1146_v19, 0.0  ;;  %v881_v27 = vadd.f32 %v3171_v49, %v880_v23  ;;  %v1149_v28 = vadd.f32 %v3171_v49, %v1148_v24  ;;  %v2441_v29 = vpop.f32.mrb[23].mxu0  ;;  %v2509_v30 = vpop.f32.mrb[23].mxu1 }
 0x151   : > { %v3217_v31 = vmax.f32 %v950_v25, %v1218_v26  ;;  %v951_v32 = vmax.f32 %v881_v27, 0.0  ;;  %v1219_v33 = vmax.f32 %v1149_v28, 0.0 }
 0x153   : > { %v3219_v34 = vmax.f32 %v951_v32, %v1219_v33 }
 0x154   : > { %v885_v35 = vpop.f32.mrb[24].mxu0  ;;  %v1153_v37 = vpop.f32.mrb[24].mxu1 }
 0x155   : > { %v886_v38 = vadd.f32 %v3171_v49, %v885_v35  ;;  %v1154_v40 = vadd.f32 %v3171_v49, %v1153_v37  ;;  %v2444_v41 = vpop.f32.mrb[25].mxu0  ;;  %v2512_v42 = vpop.f32.mrb[25].mxu1 }
 0x156   : > { %v888_v43 = vpop.f32.mrb[26].mxu0  ;;  %v1156_v44 = vpop.f32.mrb[26].mxu1 }
 0x157   : > { %v952_v45 = vmax.f32 %v886_v38, 0.0  ;;  %v1220_v46 = vmax.f32 %v1154_v40, 0.0  ;;  %v889_v47 = vadd.f32 %v3171_v49, %v888_v43  ;;  %v1157_v48 = vadd.f32 %v3171_v49, %v1156_v44  ;;  %v2445_v50 = vpop.f32.mrb[27].mxu0  ;;  %v2513_v51 = vpop.f32.mrb[27].mxu1 }
 0x159   : > { %v3225_v52 = vmax.f32 %v952_v45, %v1220_v46  ;;  %v953_v54 = vmax.f32 %v889_v47, 0.0  ;;  %v1221_v55 = vmax.f32 %v1157_v48, 0.0 }
 0x15b   : > { %v3227_v57 = vmax.f32 %v953_v54, %v1221_v55 }
 0x15c   : > { %v893_v58 = vpop.f32.mrb[28].mxu0  ;;  %v1161_v59 = vpop.f32.mrb[28].mxu1 }
 0x15d   : > { %v894_v60 = vadd.f32 %v3171_v49, %v893_v58  ;;  %v1162_v61 = vadd.f32 %v3171_v49, %v1161_v59  ;;  %v2448_v62 = vpop.f32.mrb[29].mxu0  ;;  %v2516_v63 = vpop.f32.mrb[29].mxu1 }
 0x15e   : > { %v896_v1 = vpop.f32.mrb[30].mxu0  ;;  %v1164_v2 = vpop.f32.mrb[30].mxu1 }
 0x15f   : > { %v954_v4 = vmax.f32 %v894_v60, 0.0  ;;  %v1222_v5 = vmax.f32 %v1162_v61, 0.0  ;;  %v897_v6 = vadd.f32 %v3171_v49, %v896_v1  ;;  %v1165_v7 = vadd.f32 %v3171_v49, %v1164_v2  ;;  %v2449_v8 = vpop.f32.mrb[31].mxu0  ;;  %v2517_v9 = vpop.f32.mrb[31].mxu1 }
 0x161   : > { %v3233_v10 = vmax.f32 %v954_v4, %v1222_v5  ;;  %v955_v12 = vmax.f32 %v897_v6, 0.0  ;;  %v1223_v13 = vmax.f32 %v1165_v7, 0.0 }
 0x163   : > { %v3235_v15 = vmax.f32 %v955_v12, %v1223_v13 }
 0x164   : > { %v901_v16 = vpop.f32.mrb[32].mxu0  ;;  %v1169_v17 = vpop.f32.mrb[32].mxu1 }
 0x165   : > { %v902_v19 = vadd.f32 %v3171_v49, %v901_v16  ;;  %v1170_v20 = vadd.f32 %v3171_v49, %v1169_v17  ;;  %v2452_v22 = vpop.f32.mrb[33].mxu0  ;;  %v2520_v23 = vpop.f32.mrb[33].mxu1 }
 0x166   : > { %v904_v24 = vpop.f32.mrb[34].mxu0  ;;  %v1172_v25 = vpop.f32.mrb[34].mxu1 }
 0x167   : > { %v956_v26 = vmax.f32 %v902_v19, 0.0  ;;  %v1224_v27 = vmax.f32 %v1170_v20, 0.0  ;;  %v905_v28 = vadd.f32 %v3171_v49, %v904_v24  ;;  %v1173_v29 = vadd.f32 %v3171_v49, %v1172_v25  ;;  %v2453_v30 = vpop.f32.mrb[35].mxu0  ;;  %v2521_v32 = vpop.f32.mrb[35].mxu1 }
 0x169   : > { %v3241_v33 = vmax.f32 %v956_v26, %v1224_v27  ;;  %v957_v35 = vmax.f32 %v905_v28, 0.0  ;;  %v1225_v37 = vmax.f32 %v1173_v29, 0.0 }
 0x16b   : > { %v3243_v38 = vmax.f32 %v957_v35, %v1225_v37 }
 0x16c   : > { %v909_v40 = vpop.f32.mrb[36].mxu0  ;;  %v1177_v41 = vpop.f32.mrb[36].mxu1 }
 0x16d   : > { %v910_v42 = vadd.f32 %v3171_v49, %v909_v40  ;;  %v1178_v43 = vadd.f32 %v3171_v49, %v1177_v41  ;;  %v2456_v44 = vpop.f32.mrb[37].mxu0  ;;  %v2524_v45 = vpop.f32.mrb[37].mxu1 }
 0x16e   : > { %v912_v46 = vpop.f32.mrb[38].mxu0  ;;  %v1180_v47 = vpop.f32.mrb[38].mxu1 }
 0x16f   : > { %v958_v48 = vmax.f32 %v910_v42, 0.0  ;;  %v1226_v50 = vmax.f32 %v1178_v43, 0.0  ;;  %v913_v51 = vadd.f32 %v3171_v49, %v912_v46  ;;  %v1181_v54 = vadd.f32 %v3171_v49, %v1180_v47  ;;  %v2457_v55 = vpop.f32.mrb[39].mxu0  ;;  %v2525_v58 = vpop.f32.mrb[39].mxu1 }
 0x171   : > { %v3249_v59 = vmax.f32 %v958_v48, %v1226_v50  ;;  %v959_v60 = vmax.f32 %v913_v51, 0.0  ;;  %v1227_v61 = vmax.f32 %v1181_v54, 0.0 }
 0x173   : > { %v3251_v62 = vmax.f32 %v959_v60, %v1227_v61 }
 0x174   : > { %v917_v63 = vpop.f32.mrb[40].mxu0  ;;  %v1185_v1 = vpop.f32.mrb[40].mxu1 }
 0x175   : > { %v918_v2 = vadd.f32 %v3171_v49, %v917_v63  ;;  %v1186_v4 = vadd.f32 %v3171_v49, %v1185_v1  ;;  %v2460_v5 = vpop.f32.mrb[41].mxu0  ;;  %v2528_v6 = vpop.f32.mrb[41].mxu1 }
 0x176   : > { %v920_v7 = vpop.f32.mrb[42].mxu0  ;;  %v1188_v8 = vpop.f32.mrb[42].mxu1 }
 0x177   : > { %v960_v9 = vmax.f32 %v918_v2, 0.0  ;;  %v1228_v12 = vmax.f32 %v1186_v4, 0.0  ;;  %v921_v13 = vadd.f32 %v3171_v49, %v920_v7  ;;  %v1189_v16 = vadd.f32 %v3171_v49, %v1188_v8  ;;  %v2461_v17 = vpop.f32.mrb[43].mxu0  ;;  %v2529_v19 = vpop.f32.mrb[43].mxu1 }
 0x179   : > { %v3257_v20 = vmax.f32 %v960_v9, %v1228_v12  ;;  %v961_v22 = vmax.f32 %v921_v13, 0.0  ;;  %v1229_v23 = vmax.f32 %v1189_v16, 0.0 }
 0x17b   : > { %v3259_v24 = vmax.f32 %v961_v22, %v1229_v23 }
 0x17c   : > { %v925_v25 = vpop.f32.mrb[44].mxu0  ;;  %v1193_v26 = vpop.f32.mrb[44].mxu1 }
 0x17d   : > { %v926_v27 = vadd.f32 %v3171_v49, %v925_v25  ;;  %v1194_v28 = vadd.f32 %v3171_v49, %v1193_v26  ;;  %v2464_v29 = vpop.f32.mrb[45].mxu0  ;;  %v2532_v30 = vpop.f32.mrb[45].mxu1 }
 0x17e   : > { %v928_v32 = vpop.f32.mrb[46].mxu0  ;;  %v1196_v35 = vpop.f32.mrb[46].mxu1 }
 0x17f   : > { %v962_v37 = vmax.f32 %v926_v27, 0.0  ;;  %v1230_v40 = vmax.f32 %v1194_v28, 0.0  ;;  %v929_v41 = vadd.f32 %v3171_v49, %v928_v32  ;;  %v1197_v42 = vadd.f32 %v3171_v49, %v1196_v35  ;;  %v2465_v43 = vpop.f32.mrb[47].mxu0  ;;  %v2533_v44 = vpop.f32.mrb[47].mxu1 }
 0x181   : > { %v3265_v45 = vmax.f32 %v962_v37, %v1230_v40  ;;  %v963_v46 = vmax.f32 %v929_v41, 0.0  ;;  %v1231_v47 = vmax.f32 %v1197_v42, 0.0 }
 0x183   : > { %v3267_v48 = vmax.f32 %v963_v46, %v1231_v47 }
 0x184   : > { %v933_v50 = vpop.f32.mrb[48].mxu0  ;;  %v1201_v51 = vpop.f32.mrb[48].mxu1 }
 0x185   : > { %v934_v54 = vadd.f32 %v3171_v49, %v933_v50  ;;  %v1202_v55 = vadd.f32 %v3171_v49, %v1201_v51  ;;  %v2468_v58 = vpop.f32.mrb[49].mxu0  ;;  %v2536_v60 = vpop.f32.mrb[49].mxu1 }
 0x186   : > { %v936_v61 = vpop.f32.mrb[50].mxu0  ;;  %v1204_v63 = vpop.f32.mrb[50].mxu1 }
 0x187   : > { %v964_v1 = vmax.f32 %v934_v54, 0.0  ;;  %v1232_v2 = vmax.f32 %v1202_v55, 0.0  ;;  %v937_v4 = vadd.f32 %v3171_v49, %v936_v61  ;;  %v1205_v5 = vadd.f32 %v3171_v49, %v1204_v63  ;;  %v2469_v6 = vpop.f32.mrb[51].mxu0  ;;  %v2537_v7 = vpop.f32.mrb[51].mxu1 }
 0x189   : > { %v3275_v8 = vmax.f32 %v964_v1, %v1232_v2  ;;  %v965_v9 = vmax.f32 %v937_v4, 0.0  ;;  %v1233_v12 = vmax.f32 %v1205_v5, 0.0 }
 0x18b   : > { %v3277_v13 = vmax.f32 %v965_v9, %v1233_v12 }
 0x18c   : > { %v1399_v16 = vpop.f32.mrb[52].mxu0  ;;  %v1693_v17 = vpop.f32.mrb[52].mxu1 }
 0x18d   : > { %v1400_v19 = vadd.f32 %v3171_v49, %v1399_v16  ;;  %v1694_v22 = vadd.f32 %v3171_v49, %v1693_v17  ;;  %v2556_v23 = vpop.f32.mrb[53].mxu0  ;;  %v2624_v25 = vpop.f32.mrb[53].mxu1 }
 0x18e   : > { %v1402_v26 = vpop.f32.mrb[54].mxu0  ;;  %v1696_v27 = vpop.f32.mrb[54].mxu1 }
 0x18f   : > { %v1502_v28 = vmax.f32 %v1400_v19, 0.0  ;;  %v1796_v29 = vmax.f32 %v1694_v22, 0.0  ;;  %v1403_v30 = vadd.f32 %v3171_v49, %v1402_v26  ;;  %v1697_v32 = vadd.f32 %v3171_v49, %v1696_v27  ;;  %v2557_v35 = vpop.f32.mrb[55].mxu0  ;;  %v2625_v37 = vpop.f32.mrb[55].mxu1 }
 0x191   : > { %v1528_v40 = vmax.f32 %v3177_v0, %v1502_v28  ;;  %v1503_v41 = vmax.f32 %v1403_v30, 0.0  ;;  %v1797_v44 = vmax.f32 %v1697_v32, 0.0 }
 0x193   : > { %v1822_v42 = vmax.f32 %v1528_v40, %v1796_v29  ;;  %v1529_v43 = vmax.f32 %v3179_v3, %v1503_v41 }
 0x194   : > { %v1407_v46 = vpop.f32.mrb[56].mxu0  ;;  %v1701_v47 = vpop.f32.mrb[56].mxu1 }
 0x195   : > { %v1823_v50 = vmax.f32 %v1529_v43, %v1797_v44  ;;  %v1408_v51 = vadd.f32 %v3171_v49, %v1407_v46  ;;  %v1702_v54 = vadd.f32 %v3171_v49, %v1701_v47  ;;  %v2560_v55 = vpop.f32.mrb[57].mxu0  ;;  %v2628_v58 = vpop.f32.mrb[57].mxu1 }
 0x196   : > { %v1410_v0 = vpop.f32.mrb[58].mxu0  ;;  %v1704_v60 = vpop.f32.mrb[58].mxu1 }
 0x197   : > { %v2244_v3 = vpack.c.bf16 %v1823_v50, %v1822_v42  ;;  %v1504_v61 = vmax.f32 %v1408_v51, 0.0  ;;  %v1798_v63 = vmax.f32 %v1702_v54, 0.0  ;;  %v1411_v1 = vadd.f32 %v3171_v49, %v1410_v0  ;;  %v2561_v2 = vpop.f32.mrb[59].mxu0  ;;  %v2629_v4 = vpop.f32.mrb[59].mxu1 }
 0x198   : > { %v1705_v5 = vadd.f32 %v3171_v49, %v1704_v60 }
 0x199   : > { %2245 = vst [vmem:[%s3290_s28] sm:$0xff] %v2244_v3   ;;  %v1530_v6 = vmax.f32 %v3185_v18, %v1504_v61  ;;  %v1505_v7 = vmax.f32 %v1411_v1, 0.0 }
 0x19a   : > { %v1799_v16 = vmax.f32 %v1705_v5, 0.0 }
 0x19b   : > { %v1824_v9 = vmax.f32 %v1530_v6, %v1798_v63  ;;  %v1531_v12 = vmax.f32 %v3187_v21, %v1505_v7 }
 0x19c   : > { %v1415_v17 = vpop.f32.mrb[60].mxu0  ;;  %v1709_v19 = vpop.f32.mrb[60].mxu1 }
 0x19d   : > { %v1825_v22 = vmax.f32 %v1531_v12, %v1799_v16  ;;  %v1416_v23 = vadd.f32 %v3171_v49, %v1415_v17  ;;  %v1710_v25 = vadd.f32 %v3171_v49, %v1709_v19  ;;  %v2564_v26 = vpop.f32.mrb[61].mxu0  ;;  %v2632_v27 = vpop.f32.mrb[61].mxu1 }
 0x19e   : > { %v1418_v28 = vpop.f32.mrb[62].mxu0  ;;  %v1712_v29 = vpop.f32.mrb[62].mxu1 }
 0x19f   : > { %v2249_v30 = vpack.c.bf16 %v1825_v22, %v1824_v9  ;;  %v1506_v32 = vmax.f32 %v1416_v23, 0.0  ;;  %v1800_v18 = vmax.f32 %v1710_v25, 0.0  ;;  %v1419_v35 = vadd.f32 %v3171_v49, %v1418_v28  ;;  %v2565_v37 = vpop.f32.mrb[63].mxu0  ;;  %v2633_v21 = vpop.f32.mrb[63].mxu1 }
 0x1a0   : > { %v1713_v40 = vadd.f32 %v3171_v49, %v1712_v29 }
 0x1a1   : > { %2306 = vst [vmem:[%s3290_s28 + $0x8] sm:$0xff] %v2249_v30   ;;  %v1532_v41 = vmax.f32 %v3193_v36, %v1506_v32  ;;  %v1507_v42 = vmax.f32 %v1419_v35, 0.0 }
 0x1a2   : > { %v1801_v46 = vmax.f32 %v1713_v40, 0.0 }
 0x1a3   : > { %v1826_v43 = vmax.f32 %v1532_v41, %v1800_v18  ;;  %v1533_v44 = vmax.f32 %v3195_v39, %v1507_v42 }
 0x1a4   : > { %v1423_v47 = vpop.f32.mrb[64].mxu0  ;;  %v1717_v50 = vpop.f32.mrb[64].mxu1 }
 0x1a5   : > { %v1827_v51 = vmax.f32 %v1533_v44, %v1801_v46  ;;  %v1424_v54 = vadd.f32 %v3171_v49, %v1423_v47  ;;  %v1718_v55 = vadd.f32 %v3171_v49, %v1717_v50  ;;  %v2568_v58 = vpop.f32.mrb[65].mxu0  ;;  %v2636_v0 = vpop.f32.mrb[65].mxu1 }
 0x1a6   : > { %v1426_v60 = vpop.f32.mrb[66].mxu0  ;;  %v1720_v3 = vpop.f32.mrb[66].mxu1 }
 0x1a7   : > { %v2254_v61 = vpack.c.bf16 %v1827_v51, %v1826_v43  ;;  %v1508_v63 = vmax.f32 %v1424_v54, 0.0  ;;  %v1802_v36 = vmax.f32 %v1718_v55, 0.0  ;;  %v1427_v1 = vadd.f32 %v3171_v49, %v1426_v60  ;;  %v2569_v2 = vpop.f32.mrb[67].mxu0  ;;  %v2637_v39 = vpop.f32.mrb[67].mxu1 }
 0x1a8   : > { %v1721_v4 = vadd.f32 %v3171_v49, %v1720_v3 }
 0x1a9   : > { %2307 = vst [vmem:[%s3290_s28 + $0x10] sm:$0xff] %v2254_v61   ;;  %v1534_v5 = vmax.f32 %v3201_v56, %v1508_v63  ;;  %v1509_v6 = vmax.f32 %v1427_v1, 0.0 }
 0x1aa   : > { %v1803_v12 = vmax.f32 %v1721_v4, 0.0 }
 0x1ab   : > { %v1828_v7 = vmax.f32 %v1534_v5, %v1802_v36  ;;  %v1535_v9 = vmax.f32 %v3203_v53, %v1509_v6 }
 0x1ac   : > { %v1431_v16 = vpop.f32.mrb[68].mxu0  ;;  %v1725_v17 = vpop.f32.mrb[68].mxu1 }
 0x1ad   : > { %v1829_v19 = vmax.f32 %v1535_v9, %v1803_v12  ;;  %v1432_v22 = vadd.f32 %v3171_v49, %v1431_v16  ;;  %v1726_v23 = vadd.f32 %v3171_v49, %v1725_v17  ;;  %v2572_v25 = vpop.f32.mrb[69].mxu0  ;;  %v2640_v26 = vpop.f32.mrb[69].mxu1 }
 0x1ae   : > { %v1434_v27 = vpop.f32.mrb[70].mxu0  ;;  %v1728_v28 = vpop.f32.mrb[70].mxu1 }
 0x1af   : > { %v2259_v29 = vpack.c.bf16 %v1829_v19, %v1828_v7  ;;  %v1510_v30 = vmax.f32 %v1432_v22, 0.0  ;;  %v1804_v56 = vmax.f32 %v1726_v23, 0.0  ;;  %v1435_v32 = vadd.f32 %v3171_v49, %v1434_v27  ;;  %v2573_v18 = vpop.f32.mrb[71].mxu0  ;;  %v2641_v53 = vpop.f32.mrb[71].mxu1 }
 0x1b0   : > { %v1729_v35 = vadd.f32 %v3171_v49, %v1728_v28 }
 0x1b1   : > { %2308 = vst [vmem:[%s3290_s28 + $0x18] sm:$0xff] %v2259_v29   ;;  %v1536_v37 = vmax.f32 %v3209_v11, %v1510_v30  ;;  %v1511_v21 = vmax.f32 %v1435_v32, 0.0 }
 0x1b2   : > { %v1805_v42 = vmax.f32 %v1729_v35, 0.0 }
 0x1b3   : > { %v1830_v40 = vmax.f32 %v1536_v37, %v1804_v56  ;;  %v1537_v41 = vmax.f32 %v3211_v14, %v1511_v21 }
 0x1b4   : > { %v1439_v43 = vpop.f32.mrb[72].mxu0  ;;  %v1733_v44 = vpop.f32.mrb[72].mxu1 }
 0x1b5   : > { %v1831_v46 = vmax.f32 %v1537_v41, %v1805_v42  ;;  %v1440_v47 = vadd.f32 %v3171_v49, %v1439_v43  ;;  %v1734_v50 = vadd.f32 %v3171_v49, %v1733_v44  ;;  %v2576_v51 = vpop.f32.mrb[73].mxu0  ;;  %v2644_v54 = vpop.f32.mrb[73].mxu1 }
 0x1b6   : > { %v1442_v55 = vpop.f32.mrb[74].mxu0  ;;  %v1736_v58 = vpop.f32.mrb[74].mxu1 }
 0x1b7   : > { %v2264_v0 = vpack.c.bf16 %v1831_v46, %v1830_v40  ;;  %v1512_v60 = vmax.f32 %v1440_v47, 0.0  ;;  %v1806_v11 = vmax.f32 %v1734_v50, 0.0  ;;  %v1443_v3 = vadd.f32 %v3171_v49, %v1442_v55  ;;  %v2577_v61 = vpop.f32.mrb[75].mxu0  ;;  %v2645_v14 = vpop.f32.mrb[75].mxu1 }
 0x1b8   : > { %v1737_v63 = vadd.f32 %v3171_v49, %v1736_v58 }
 0x1b9   : > { %2309 = vst [vmem:[%s3290_s28 + $0x20] sm:$0xff] %v2264_v0   ;;  %v1538_v36 = vmax.f32 %v3217_v31, %v1512_v60  ;;  %v1513_v1 = vmax.f32 %v1443_v3, 0.0 }
 0x1ba   : > { %v1807_v4 = vmax.f32 %v1737_v63, 0.0 }
 0x1bb   : > { %v1832_v2 = vmax.f32 %v1538_v36, %v1806_v11  ;;  %v1539_v39 = vmax.f32 %v3219_v34, %v1513_v1 }
 0x1bc   : > { %v1447_v5 = vpop.f32.mrb[76].mxu0  ;;  %v1741_v6 = vpop.f32.mrb[76].mxu1 }
 0x1bd   : > { %v1833_v7 = vmax.f32 %v1539_v39, %v1807_v4  ;;  %v1448_v9 = vadd.f32 %v3171_v49, %v1447_v5  ;;  %v1742_v12 = vadd.f32 %v3171_v49, %v1741_v6  ;;  %v2580_v16 = vpop.f32.mrb[77].mxu0  ;;  %v2648_v17 = vpop.f32.mrb[77].mxu1 }
 0x1be   : > { %v1450_v19 = vpop.f32.mrb[78].mxu0  ;;  %v1744_v22 = vpop.f32.mrb[78].mxu1 }
 0x1bf   : > { %v2269_v23 = vpack.c.bf16 %v1833_v7, %v1832_v2  ;;  %v1514_v25 = vmax.f32 %v1448_v9, 0.0  ;;  %v1808_v31 = vmax.f32 %v1742_v12, 0.0  ;;  %v1451_v26 = vadd.f32 %v3171_v49, %v1450_v19  ;;  %v2581_v27 = vpop.f32.mrb[79].mxu0  ;;  %v2649_v34 = vpop.f32.mrb[79].mxu1 }
 0x1c0   : > { %v1745_v28 = vadd.f32 %v3171_v49, %v1744_v22 }
 0x1c1   : > { %2310 = vst [vmem:[%s3290_s28 + $0x28] sm:$0xff] %v2269_v23   ;;  %v1540_v29 = vmax.f32 %v3225_v52, %v1514_v25  ;;  %v1515_v30 = vmax.f32 %v1451_v26, 0.0 }
 0x1c2   : > { %v1809_v18 = vmax.f32 %v1745_v28, 0.0 }
 0x1c3   : > { %v1834_v56 = vmax.f32 %v1540_v29, %v1808_v31  ;;  %v1541_v32 = vmax.f32 %v3227_v57, %v1515_v30 }
 0x1c4   : > { %v1455_v53 = vpop.f32.mrb[80].mxu0  ;;  %v1749_v35 = vpop.f32.mrb[80].mxu1 }
 0x1c5   : > { %v1835_v37 = vmax.f32 %v1541_v32, %v1809_v18  ;;  %v1456_v21 = vadd.f32 %v3171_v49, %v1455_v53  ;;  %v1750_v40 = vadd.f32 %v3171_v49, %v1749_v35  ;;  %v2584_v41 = vpop.f32.mrb[81].mxu0  ;;  %v2652_v42 = vpop.f32.mrb[81].mxu1 }
 0x1c6   : > { %v1458_v43 = vpop.f32.mrb[82].mxu0  ;;  %v1752_v44 = vpop.f32.mrb[82].mxu1 }
 0x1c7   : > { %v2274_v46 = vpack.c.bf16 %v1835_v37, %v1834_v56  ;;  %v1516_v47 = vmax.f32 %v1456_v21, 0.0  ;;  %v1810_v52 = vmax.f32 %v1750_v40, 0.0  ;;  %v1459_v50 = vadd.f32 %v3171_v49, %v1458_v43  ;;  %v2585_v51 = vpop.f32.mrb[83].mxu0  ;;  %v2653_v57 = vpop.f32.mrb[83].mxu1 }
 0x1c8   : > { %v1753_v54 = vadd.f32 %v3171_v49, %v1752_v44 }
 0x1c9   : > { %2311 = vst [vmem:[%s3290_s28 + $0x30] sm:$0xff] %v2274_v46   ;;  %v1542_v55 = vmax.f32 %v3233_v10, %v1516_v47  ;;  %v1517_v58 = vmax.f32 %v1459_v50, 0.0 }
 0x1ca   : > { %v1811_v11 = vmax.f32 %v1753_v54, 0.0 }
 0x1cb   : > { %v1836_v0 = vmax.f32 %v1542_v55, %v1810_v52  ;;  %v1543_v60 = vmax.f32 %v3235_v15, %v1517_v58 }
 0x1cc   : > { %v1463_v3 = vpop.f32.mrb[84].mxu0  ;;  %v1757_v61 = vpop.f32.mrb[84].mxu1 }
 0x1cd   : > { %v1837_v14 = vmax.f32 %v1543_v60, %v1811_v11  ;;  %v1464_v63 = vadd.f32 %v3171_v49, %v1463_v3  ;;  %v1758_v36 = vadd.f32 %v3171_v49, %v1757_v61  ;;  %v2588_v1 = vpop.f32.mrb[85].mxu0  ;;  %v2656_v2 = vpop.f32.mrb[85].mxu1 }
 0x1ce   : > { %v1466_v39 = vpop.f32.mrb[86].mxu0  ;;  %v1760_v4 = vpop.f32.mrb[86].mxu1 }
 0x1cf   : > { %v2279_v5 = vpack.c.bf16 %v1837_v14, %v1836_v0  ;;  %v1518_v6 = vmax.f32 %v1464_v63, 0.0  ;;  %v1812_v10 = vmax.f32 %v1758_v36, 0.0  ;;  %v1467_v7 = vadd.f32 %v3171_v49, %v1466_v39  ;;  %v2589_v9 = vpop.f32.mrb[87].mxu0  ;;  %v2657_v15 = vpop.f32.mrb[87].mxu1 }
 0x1d0   : > { %v1761_v12 = vadd.f32 %v3171_v49, %v1760_v4 }
 0x1d1   : > { %2312 = vst [vmem:[%s3290_s28 + $0x38] sm:$0xff] %v2279_v5   ;;  %v1544_v16 = vmax.f32 %v3241_v33, %v1518_v6  ;;  %v1519_v17 = vmax.f32 %v1467_v7, 0.0 }
 0x1d2   : > { %v1813_v23 = vmax.f32 %v1761_v12, 0.0 }
 0x1d3   : > { %v1838_v19 = vmax.f32 %v1544_v16, %v1812_v10  ;;  %v1545_v22 = vmax.f32 %v3243_v38, %v1519_v17 }
 0x1d4   : > { %v1471_v25 = vpop.f32.mrb[88].mxu0  ;;  %v1765_v31 = vpop.f32.mrb[88].mxu1 }
 0x1d5   : > { %v1839_v26 = vmax.f32 %v1545_v22, %v1813_v23  ;;  %v1472_v27 = vadd.f32 %v3171_v49, %v1471_v25  ;;  %v1766_v34 = vadd.f32 %v3171_v49, %v1765_v31  ;;  %v2592_v28 = vpop.f32.mrb[89].mxu0  ;;  %v2660_v29 = vpop.f32.mrb[89].mxu1 }
 0x1d6   : > { %v1474_v30 = vpop.f32.mrb[90].mxu0  ;;  %v1768_v56 = vpop.f32.mrb[90].mxu1 }
 0x1d7   : > { %v2284_v32 = vpack.c.bf16 %v1839_v26, %v1838_v19  ;;  %v1520_v18 = vmax.f32 %v1472_v27, 0.0  ;;  %v1814_v33 = vmax.f32 %v1766_v34, 0.0  ;;  %v1475_v53 = vadd.f32 %v3171_v49, %v1474_v30  ;;  %v2593_v35 = vpop.f32.mrb[91].mxu0  ;;  %v2661_v38 = vpop.f32.mrb[91].mxu1 }
 0x1d8   : > { %v1769_v37 = vadd.f32 %v3171_v49, %v1768_v56 }
 0x1d9   : > { %2313 = vst [vmem:[%s3290_s28 + $0x40] sm:$0xff] %v2284_v32   ;;  %v1546_v21 = vmax.f32 %v3249_v59, %v1520_v18  ;;  %v1521_v40 = vmax.f32 %v1475_v53, 0.0 }
 0x1da   : > { %v1815_v43 = vmax.f32 %v1769_v37, 0.0 }
 0x1db   : > { %v1840_v41 = vmax.f32 %v1546_v21, %v1814_v33  ;;  %v1547_v42 = vmax.f32 %v3251_v62, %v1521_v40 }
 0x1dc   : > { %v1479_v44 = vpop.f32.mrb[92].mxu0  ;;  %v1773_v46 = vpop.f32.mrb[92].mxu1 }
 0x1dd   : > { %v1841_v47 = vmax.f32 %v1547_v42, %v1815_v43  ;;  %v1480_v52 = vadd.f32 %v3171_v49, %v1479_v44  ;;  %v1774_v50 = vadd.f32 %v3171_v49, %v1773_v46  ;;  %v2596_v51 = vpop.f32.mrb[93].mxu0  ;;  %v2664_v57 = vpop.f32.mrb[93].mxu1 }
 0x1de   : > { %v1482_v54 = vpop.f32.mrb[94].mxu0  ;;  %v1776_v55 = vpop.f32.mrb[94].mxu1 }
 0x1df   : > { %v2289_v58 = vpack.c.bf16 %v1841_v47, %v1840_v41  ;;  %v1522_v0 = vmax.f32 %v1480_v52, 0.0  ;;  %v1816_v59 = vmax.f32 %v1774_v50, 0.0  ;;  %v1483_v60 = vadd.f32 %v3171_v49, %v1482_v54  ;;  %v2597_v11 = vpop.f32.mrb[95].mxu0  ;;  %v2665_v62 = vpop.f32.mrb[95].mxu1 }
 0x1e0   : > { %v1777_v3 = vadd.f32 %v3171_v49, %v1776_v55 }
 0x1e1   : > { %2314 = vst [vmem:[%s3290_s28 + $0x48] sm:$0xff] %v2289_v58   ;;  %v1548_v61 = vmax.f32 %v3257_v20, %v1522_v0  ;;  %v1523_v14 = vmax.f32 %v1483_v60, 0.0 }
 0x1e2   : > { %v1817_v1 = vmax.f32 %v1777_v3, 0.0 }
 0x1e3   : > { %v1842_v63 = vmax.f32 %v1548_v61, %v1816_v59  ;;  %v1549_v36 = vmax.f32 %v3259_v24, %v1523_v14 }
 0x1e4   : > { %v1487_v2 = vpop.f32.mrb[96].mxu0  ;;  %v1781_v39 = vpop.f32.mrb[96].mxu1 }
 0x1e5   : > { %v1843_v4 = vmax.f32 %v1549_v36, %v1817_v1  ;;  %v1488_v5 = vadd.f32 %v3171_v49, %v1487_v2  ;;  %v1782_v6 = vadd.f32 %v3171_v49, %v1781_v39  ;;  %v2600_v10 = vpop.f32.mrb[97].mxu0  ;;  %v2668_v7 = vpop.f32.mrb[97].mxu1 }
 0x1e6   : > { %v1490_v9 = vpop.f32.mrb[98].mxu0  ;;  %v1784_v15 = vpop.f32.mrb[98].mxu1 }
 0x1e7   : > { %v2294_v12 = vpack.c.bf16 %v1843_v4, %v1842_v63  ;;  %v1524_v16 = vmax.f32 %v1488_v5, 0.0  ;;  %v1818_v20 = vmax.f32 %v1782_v6, 0.0  ;;  %v1491_v17 = vadd.f32 %v3171_v49, %v1490_v9  ;;  %v2601_v19 = vpop.f32.mrb[99].mxu0  ;;  %v2669_v24 = vpop.f32.mrb[99].mxu1 }
 0x1e8   : > { %v1785_v22 = vadd.f32 %v3171_v49, %v1784_v15 }
 0x1e9   : > { %2315 = vst [vmem:[%s3290_s28 + $0x50] sm:$0xff] %v2294_v12   ;;  %v1550_v23 = vmax.f32 %v3265_v45, %v1524_v16  ;;  %v1525_v25 = vmax.f32 %v1491_v17, 0.0 }
 0x1ea   : > { %v1819_v27 = vmax.f32 %v1785_v22, 0.0 }
 0x1eb   : > { %v1844_v31 = vmax.f32 %v1550_v23, %v1818_v20  ;;  %v1551_v26 = vmax.f32 %v3267_v48, %v1525_v25  ;;  %v2762_v48 = vld [vmem:[%s3388_s2] ss:$0 sm:$0xff] }
 0x1ec   : > { %v1495_v34 = vpop.f32.mrb[100].mxu0  ;;  %v1789_v28 = vpop.f32.mrb[100].mxu1 }
 0x1ed   : > { %v1845_v29 = vmax.f32 %v1551_v26, %v1819_v27  ;;  %v1496_v30 = vadd.f32 %v3171_v49, %v1495_v34  ;;  %v1790_v56 = vadd.f32 %v3171_v49, %v1789_v28  ;;  %v2604_v32 = vpop.f32.mrb[101].mxu0  ;;  %v2672_v18 = vpop.f32.mrb[101].mxu1 }
 0x1ee   : > { %v1498_v33 = vpop.f32.mrb[102].mxu0  ;;  %v1792_v53 = vpop.f32.mrb[102].mxu1 }
 0x1ef   : > { %v2299_v35 = vpack.c.bf16 %v1845_v29, %v1844_v31  ;;  %v1526_v45 = vmax.f32 %v1496_v30, 0.0  ;;  %v1820_v38 = vmax.f32 %v1790_v56, 0.0  ;;  %v1499_v37 = vadd.f32 %v2762_v48, %v1498_v33  ;;  %v2605_v21 = vpop.f32.mrb[103].mxu0  ;;  %v2673_v40 = vpop.f32.mrb[103].mxu1 }
 0x1f0   : > { %v1793_v41 = vadd.f32 %v2762_v48, %v1792_v53 }
 0x1f1   : > { %2316 = vst [vmem:[%s3290_s28 + $0x58] sm:$0xff] %v2299_v35   ;;  %v1552_v42 = vmax.f32 %v3275_v8, %v1526_v45  ;;  %v1527_v49 = vmax.f32 %v1499_v37, 0.0 }
 0x1f2   : > { %v1821_v46 = vmax.f32 %v1793_v41, 0.0 }
 0x1f3   : > { %v1846_v43 = vmax.f32 %v1552_v42, %v1820_v38  ;;  %v1553_v44 = vmax.f32 %v3277_v13, %v1527_v49 }
 0x1f5   : > { %v1847_v47 = vmax.f32 %v1553_v44, %v1821_v46 }
 0x1f7   : > { %v2304_v52 = vpack.c.bf16 %v1847_v47, %v1846_v43 }
 0x1f9   : > { %2317 = vst [vmem:[%s3290_s28 + $0x60] sm:$0xff] %v2304_v52  }
 0x1fa PF: > { %p10_p9 = scmp.ge.s32.totalorder %s2826_s16, 4   ;;  %s3390_s12 = smov %s2781_s13 }
 0x1fb   : > { %s3391_s13 = smov %s2835_s19  ;;  %s3392_s14 = smov %s2826_s16 }
 0x1fc   :  { %12 = sbr.rel (!%p10_p9) target bundleno = 2 (0x2), region = 111 }

// kernel: net_forward.4
= control target key start
LH: loop header
LB: loop body
LE: loop exit
PB: predicated region body
PF: predicated region fallthrough
CT: control target
= control target key end

     0   :  { %s1110_s12 = smov 0   ;;  %s1112_s13 = smov 0   ;;  %s1303_s0 = inlined_call_operand.vmem [shape: bf16[4,64,256], index: 0, kind: input, shape index: {}]   ;;  %s1304_s1 = inlined_call_operand.vmem [shape: bf16[256,128], index: 1, kind: input, shape index: {}]   ;;  %s1305_s2 = inlined_call_operand.vmem [shape: f32[1,128], index: 2, kind: input, shape index: {}]   ;;  %s1306_s3 = inlined_call_operand.vmem [shape: bf16[64,128], index: 3, kind: output, shape index: {}]  }
   0x1   :  { %s1114_s14 = smov 0  }
   0x2 LB: > { %s810_s15 = sadd.s32 4294967295, %s1088_s14   ;;  %s1127_s16 = sadd.s32 1, %s1088_s14   ;;  %s1088_s14 = sphi %s1114_s14, %s1309_s14   ;;  %s1084_s13 = sphi %s1112_s13, %s1308_s13   ;;  %s1080_s12 = sphi %s1110_s12, %s1307_s12  }
   0x3   : > { %s17_s17 = ssub.s32 %s1088_s14, %s1127_s16  ;;  %s20_s18 = sadd.s32 1, %s1084_s13 }
   0x4   : > { %p18_p0 = scmp.eq.s32.totalorder %s17_s17, 0  ;;  %p27_p1 = scmp.ne.s32.totalorder %s1084_s13, %s1080_s12 }
   0x5   : > { %p28_p2 = scmp.eq.s32.totalorder %s1088_s14, 0  ;;  %p813_p4 = scmp.ge.s32.totalorder %s1088_s14, 2 }
   0x6   : > { %s1136_s19 = scalar_select %p18_p0, %s1084_s13, %s20_s18  }
   0x7   : > { %p29_p3 = por %p28_p2, %p27_p1  ;;  %127 = sbr.rel (%p813_p4) target bundleno = 26 (0x1a), region = 24 }
   0xe   : > { %130 = sbr.rel (!%p29_p3) target bundleno = 26 (0x1a), region = 28  ;;  %s132_s20 = sand.u32 (%p29_p3), 1, %s1084_s13  }
   0xf   : > { %s874_s21 = sshll.u32 (%p29_p3), %s1088_s14, 5  ;;  %s814_s22 = sshll.u32 (%p29_p3), %s132_s20, 7 }
  0x10   : > { %s1144_s25 = scalar_lea.vmem (%p29_p3), %s1303_s0, %s874_s21  ;;  %s134_s26 = scalar_lea.vmem (%p29_p3), [#allocation2], %s814_s22 }
  0x11   : > { %v196_v0 = vld [vmem:[%s1144_s25] sm:$0xff] (%p29_p3)  ;;  %v198_v1 = vld [vmem:[%s1144_s25 + $0x8] sm:$0xff] (%p29_p3)  ;;  %v200_v2 = vld [vmem:[%s1144_s25 + $0x10] sm:$0xff] (%p29_p3) }
  0x12   : > { %197 = vst [vmem:[%s134_s26] sm:$0xff] (%p29_p3), %v196_v0  ;;  %199 = vst [vmem:[%s134_s26 + $0x8] sm:$0xff] (%p29_p3), %v198_v1  ;;  %v202_v3 = vld [vmem:[%s1144_s25 + $0x18] sm:$0xff] (%p29_p3)  ;;  %v204_v4 = vld [vmem:[%s1144_s25 + $0x40] sm:$0xff] (%p29_p3) }
  0x13   : > { %201 = vst [vmem:[%s134_s26 + $0x10] sm:$0xff] (%p29_p3), %v200_v2  ;;  %v206_v5 = vld [vmem:[%s1144_s25 + $0x48] sm:$0xff] (%p29_p3)  ;;  %203 = vst [vmem:[%s134_s26 + $0x18] sm:$0xff] (%p29_p3), %v202_v3  ;;  %v208_v6 = vld [vmem:[%s1144_s25 + $0x50] sm:$0xff] (%p29_p3) }
  0x14   : > { %205 = vst [vmem:[%s134_s26 + $0x20] sm:$0xff] (%p29_p3), %v204_v4  ;;  %207 = vst [vmem:[%s134_s26 + $0x28] sm:$0xff] (%p29_p3), %v206_v5  ;;  %v210_v7 = vld [vmem:[%s1144_s25 + $0x58] sm:$0xff] (%p29_p3)  ;;  %v212_v8 = vld [vmem:[%s1144_s25 + $0x80] sm:$0xff] (%p29_p3) }
  0x15   : > { %209 = vst [vmem:[%s134_s26 + $0x30] sm:$0xff] %v208_v6  ;;  %211 = vst [vmem:[%s134_s26 + $0x38] sm:$0xff] %v210_v7  ;;  %v214_v9 = vld [vmem:[%s1144_s25 + $0x88] sm:$0xff]  ;;  %v216_v10 = vld [vmem:[%s1144_s25 + $0x90] sm:$0xff] }
  0x16   : > { %213 = vst [vmem:[%s134_s26 + $0x40] sm:$0xff] %v212_v8  ;;  %v218_v11 = vld [vmem:[%s1144_s25 + $0x98] sm:$0xff]  ;;  %215 = vst [vmem:[%s134_s26 + $0x48] sm:$0xff] %v214_v9  ;;  %v220_v12 = vld [vmem:[%s1144_s25 + $0xc0] sm:$0xff] }
  0x17   : > { %217 = vst [vmem:[%s134_s26 + $0x50] sm:$0xff] %v216_v10  ;;  %219 = vst [vmem:[%s134_s26 + $0x58] sm:$0xff] %v218_v11  ;;  %v222_v13 = vld [vmem:[%s1144_s25 + $0xc8] sm:$0xff]  ;;  %v224_v14 = vld [vmem:[%s1144_s25 + $0xd0] sm:$0xff] }
  0x18   : > { %221 = vst [vmem:[%s134_s26 + $0x60] sm:$0xff] %v220_v12  ;;  %223 = vst [vmem:[%s134_s26 + $0x68] sm:$0xff] %v222_v13  ;;  %v226_v15 = vld [vmem:[%s1144_s25 + $0xd8] sm:$0xff] }
  0x19   : > { %225 = vst [vmem:[%s134_s26 + $0x70] sm:$0xff] %v224_v14  ;;  %227 = vst [vmem:[%s134_s26 + $0x78] sm:$0xff] %v226_v15 }
  0x1a PF: > { %p818_p5 = scmp.ge.s32.totalorder %s1088_s14, 1  ;;  %p232_p6 = scmp.lt.s32.totalorder %s1088_s14, 3 }
  0x1c   : > { %p233_p7 = pnand %p818_p5, %p232_p6 }
  0x1d   : > { %v1026_v16 = vld [vmem:[%s1304_s1 + $0x40] sm:$0xff] (!%p233_p7)   ;;  %v1028_v18 = vld [vmem:[%s1304_s1 + $0x48] sm:$0xff] (!%p233_p7)   ;;  %v1181_v20 = vld [vmem:[%s1304_s1 + $0x50] sm:$0xff] (!%p233_p7)   ;;  %s239_s20 = sand.u32 (!%p233_p7), 1, %s1080_s12   ;;  %s820_s21 = sshll.u32 (!%p233_p7), %s810_s15, 2 }
  0x1e   : > { %236 = sbr.rel (%p233_p7) target bundleno = 330 (0x14a), region = 66  ;;  %v1027_v17 = vld [vmem:[%s1304_s1] sm:$0xff] (!%p233_p7)   ;;  %890 = vmatprep.subr.bf16.mxu0 (!%p233_p7), %v1026_v16  ;;  %918 = vmatprep.subr.bf16.mxu1 (!%p233_p7), %v1026_v16  ;;  %v1176_v19 = vld [vmem:[%s1304_s1 + $0x8] sm:$0xff] (!%p233_p7)   ;;  %v1188_v21 = vld [vmem:[%s1304_s1 + $0x10] sm:$0xff] (!%p233_p7)   ;;  %s819_s23 = sshll.u32 (!%p233_p7), %s239_s20, 7 }
  0x1f   : > { %891 = vmatpush3.bf16.msra.mxu0 (!%p233_p7), %v1027_v17  ;;  %919 = vmatpush3.bf16.msra.mxu1 (!%p233_p7), %v1027_v17  ;;  %v1195_v22 = vld [vmem:[%s1304_s1 + $0x58] sm:$0xff] (!%p233_p7)   ;;  %v1210_v24 = vld [vmem:[%s1304_s1 + $0x60] sm:$0xff] (!%p233_p7)   ;;  %v1036_v26 = vld [vmem:[%s1304_s1 + $0x68] sm:$0xff] (!%p233_p7)   ;;  %s1222_s29 = scalar_lea.vmem (!%p233_p7), [#allocation2], %s819_s23  ;;  %p264_p8 = scmp.lt.s32.totalorder (!%p233_p7), %s820_s21, 7 }
  0x20   : > { %892 = vmatprep.subr.bf16.mxu0 (!%p233_p7), %v1028_v18  ;;  %920 = vmatprep.subr.bf16.mxu1 (!%p233_p7), %v1028_v18  ;;  %v1203_v23 = vld [vmem:[%s1304_s1 + $0x18] sm:$0xff] (!%p233_p7)   ;;  %v1035_v25 = vld [vmem:[%s1304_s1 + $0x20] sm:$0xff] (!%p233_p7)   ;;  %v1037_v29 = vld [vmem:[%s1304_s1 + $0x28] sm:$0xff] (!%p233_p7)  }
  0x21   : > { %v1044_v27 = vld [vmem:[%s1222_s29 + $0x4] ss:$8 sps:$4 sm:$0xff] (!%p233_p7)   ;;  %v1038_v30 = vld [vmem:[%s1304_s1 + $0x70] sm:$0xff] (!%p233_p7)   ;;  %v1040_v32 = vld [vmem:[%s1304_s1 + $0x78] sm:$0xff] (!%p233_p7)  }
  0x22   : > { %v1047_v28 = vld [vmem:[%s1222_s29 + $0x24] ss:$8 sps:$4 sm:$0xff] (!%p233_p7)   ;;  %461 = vmatprep.mubr.bf16.mxu0 (!%p233_p7), %v1044_v27  ;;  %v1039_v31 = vld [vmem:[%s1304_s1 + $0x30] sm:$0xff] (!%p233_p7)   ;;  %v1041_v33 = vld [vmem:[%s1304_s1 + $0x38] sm:$0xff] (!%p233_p7)  }
  0x23   : > { %893 = vmatpush3.bf16.msra.mxu0 (!%p233_p7), %v1176_v19  ;;  %921 = vmatpush3.bf16.msra.mxu1 (!%p233_p7), %v1176_v19  ;;  %v1042_v34 = vld [vmem:[%s1222_s29] ss:$8 sps:$4 sm:$0xff] (!%p233_p7)   ;;  %v1048_v36 = vld [vmem:[%s1222_s29 + $0x14] ss:$8 sps:$4 sm:$0xff] (!%p233_p7)   ;;  %v1052_v38 = vld [vmem:[%s1222_s29 + $0x10] ss:$8 sps:$4 sm:$0xff] (!%p233_p7)  }
  0x24   : > { %894 = vmatprep.subr.bf16.mxu0 (!%p233_p7), %v1181_v20  ;;  %922 = vmatprep.subr.bf16.mxu1 (!%p233_p7), %v1181_v20  ;;  %v1045_v35 = vld [vmem:[%s1222_s29 + $0x20] ss:$8 sps:$4 sm:$0xff] (!%p233_p7)   ;;  %v1050_v37 = vld [vmem:[%s1222_s29 + $0x34] ss:$8 sps:$4 sm:$0xff] (!%p233_p7)   ;;  %v1053_v39 = vld [vmem:[%s1222_s29 + $0x30] ss:$8 sps:$4 sm:$0xff] (!%p233_p7)  }
  0x25   : > { %539 = vmatprep.mubr.bf16.mxu1 %v1047_v28  ;;  %v1056_v40 = vld [vmem:[%s1222_s29 + $0x44] ss:$8 sps:$4 sm:$0xff]   ;;  %v1054_v42 = vld [vmem:[%s1222_s29 + $0x40] ss:$8 sps:$4 sm:$0xff]   ;;  %v1060_v44 = vld [vmem:[%s1222_s29 + $0x54] ss:$8 sps:$4 sm:$0xff]  }
  0x26   : > { %v1059_v41 = vld [vmem:[%s1222_s29 + $0x64] ss:$8 sps:$4 sm:$0xff]   ;;  %v1057_v43 = vld [vmem:[%s1222_s29 + $0x60] ss:$8 sps:$4 sm:$0xff]   ;;  %v1062_v45 = vld [vmem:[%s1222_s29 + $0x74] ss:$8 sps:$4 sm:$0xff]  }
  0x27   : > { %895 = vmatpush3.bf16.msra.mxu0 %v1188_v21  ;;  %923 = vmatpush3.bf16.msra.mxu1 %v1188_v21  ;;  %v1064_v46 = vld [vmem:[%s1222_s29 + $0x50] ss:$8 sps:$4 sm:$0xff]   ;;  %v1270_v50 = vld [vmem:[%s1305_s2] ss:$0 sm:$0xff]  ;;  %s1311_s21 = smov (!%p264_p8, %s820_s21), 7 }
  0x28   : > { %896 = vmatprep.subr.bf16.mxu0 %v1195_v22  ;;  %924 = vmatprep.subr.bf16.mxu1 %v1195_v22  ;;  %v1065_v47 = vld [vmem:[%s1222_s29 + $0x70] ss:$8 sps:$4 sm:$0xff]   ;;  %s821_s14 = sshll.u32 %s1311_s21, 2 }
  0x29   : > { %s267_s23 = scalar_lea.vmem %s1306_s3, %s821_s14 }
  0x2b   : > { %897 = vmatpush3.bf16.msra.mxu0 %v1203_v23  ;;  %925 = vmatpush3.bf16.msra.mxu1 %v1203_v23 }
  0x2c   : > { %898 = vmatprep.subr.bf16.mxu0 %v1210_v24  ;;  %926 = vmatprep.subr.bf16.mxu1 %v1210_v24 }
  0x2f   : > { %899 = vmatpush3.bf16.msra.mxu0 %v1035_v25  ;;  %927 = vmatpush3.bf16.msra.mxu1 %v1035_v25 }
  0x30   : > { %900 = vmatprep.subr.bf16.mxu0 %v1036_v26  ;;  %928 = vmatprep.subr.bf16.mxu1 %v1036_v26 }
  0x33   : > { %901 = vmatpush3.bf16.msra.mxu0 %v1037_v29  ;;  %929 = vmatpush3.bf16.msra.mxu1 %v1037_v29 }
  0x34   : > { %902 = vmatprep.subr.bf16.mxu0 %v1038_v30  ;;  %930 = vmatprep.subr.bf16.mxu1 %v1038_v30 }
  0x37   : > { %903 = vmatpush3.bf16.msra.mxu0 %v1039_v31  ;;  %931 = vmatpush3.bf16.msra.mxu1 %v1039_v31 }
  0x38   : > { %904 = vmatprep.subr.bf16.mxu0 %v1040_v32  ;;  %932 = vmatprep.subr.bf16.mxu1 %v1040_v32 }
  0x3b   : > { %905 = vmatpush3.bf16.msra.mxu0 %v1041_v33  ;;  %933 = vmatpush3.bf16.msra.mxu1 %v1041_v33 }
  0x3c   : > { %946 = vmatprep.subr.bf16.mxu0 %v1026_v16  ;;  %974 = vmatprep.subr.bf16.mxu1 %v1026_v16 }
  0x3e   : > { %462 = vmatmul.mubr.bf16.vlgmr.msra.gmra.mrb[0].mxu0 %v1042_v34  ;;  %540 = vmatmul.mubr.bf16.vlgmr.msra.gmra.mrb[0].mxu1 %v1045_v35 }
  0x3f   : > { %947 = vmatpush3.bf16.msra.mxu0 %v1027_v17  ;;  %975 = vmatpush3.bf16.msra.mxu1 %v1027_v17 }
  0x40   : > { %948 = vmatprep.subr.bf16.mxu0 %v1028_v18  ;;  %976 = vmatprep.subr.bf16.mxu1 %v1028_v18 }
  0x41   : > { %469 = vmatprep.mubr.bf16.mxu0 %v1048_v36  ;;  %547 = vmatprep.mubr.bf16.mxu1 %v1050_v37 }
  0x43   : > { %949 = vmatpush3.bf16.msra.mxu0 %v1176_v19  ;;  %977 = vmatpush3.bf16.msra.mxu1 %v1176_v19 }
  0x44   : > { %950 = vmatprep.subr.bf16.mxu0 %v1181_v20  ;;  %978 = vmatprep.subr.bf16.mxu1 %v1181_v20 }
  0x46   : > { %470 = vmatmul.mubr.bf16.gmra.mrb[4].mxu0 %v1052_v38  ;;  %548 = vmatmul.mubr.bf16.gmra.mrb[4].mxu1 %v1053_v39 }
  0x47   : > { %951 = vmatpush3.bf16.msra.mxu0 %v1188_v21  ;;  %979 = vmatpush3.bf16.msra.mxu1 %v1188_v21 }
  0x48   : > { %952 = vmatprep.subr.bf16.mxu0 %v1195_v22  ;;  %980 = vmatprep.subr.bf16.mxu1 %v1195_v22 }
  0x49   : > { %621 = vmatprep.mubr.bf16.mxu0 %v1056_v40  ;;  %703 = vmatprep.mubr.bf16.mxu1 %v1059_v41 }
  0x4b   : > { %953 = vmatpush3.bf16.msra.mxu0 %v1203_v23  ;;  %981 = vmatpush3.bf16.msra.mxu1 %v1203_v23 }
  0x4c   : > { %954 = vmatprep.subr.bf16.mxu0 %v1210_v24  ;;  %982 = vmatprep.subr.bf16.mxu1 %v1210_v24 }
  0x4f   : > { %955 = vmatpush3.bf16.msra.mxu0 %v1035_v25  ;;  %983 = vmatpush3.bf16.msra.mxu1 %v1035_v25 }
  0x50   : > { %956 = vmatprep.subr.bf16.mxu0 %v1036_v26  ;;  %984 = vmatprep.subr.bf16.mxu1 %v1036_v26 }
  0x53   : > { %957 = vmatpush3.bf16.msra.mxu0 %v1037_v29  ;;  %985 = vmatpush3.bf16.msra.mxu1 %v1037_v29 }
  0x54   : > { %958 = vmatprep.subr.bf16.mxu0 %v1038_v30  ;;  %986 = vmatprep.subr.bf16.mxu1 %v1038_v30 }
  0x57   : > { %959 = vmatpush3.bf16.msra.mxu0 %v1039_v31  ;;  %987 = vmatpush3.bf16.msra.mxu1 %v1039_v31 }
  0x58   : > { %960 = vmatprep.subr.bf16.mxu0 %v1040_v32  ;;  %988 = vmatprep.subr.bf16.mxu1 %v1040_v32 }
  0x5b   : > { %961 = vmatpush3.bf16.msra.mxu0 %v1041_v33  ;;  %989 = vmatpush3.bf16.msra.mxu1 %v1041_v33 }
  0x5e   : > { %622 = vmatmul.mubr.bf16.vlgmr.msra.gmra.mrb[8].mxu0 %v1054_v42  ;;  %704 = vmatmul.mubr.bf16.vlgmr.msra.gmra.mrb[8].mxu1 %v1057_v43 }
  0x5f   : > { %629 = vmatprep.mubr.bf16.mxu0 %v1060_v44  ;;  %711 = vmatprep.mubr.bf16.mxu1 %v1062_v45 }
  0x66   : > { %630 = vmatmul.mubr.bf16.gmra.mrb[12].mxu0 %v1064_v46  ;;  %712 = vmatmul.mubr.bf16.gmra.mrb[12].mxu1 %v1065_v47 }
 0x111   : > { %v906_v48 = vpop.f32.mrb[0].mxu0  ;;  %v934_v49 = vpop.f32.mrb[0].mxu1 }
 0x112   : > { %v907_v51 = vpop.f32.mrb[1].mxu0  ;;  %v935_v52 = vpop.f32.mrb[1].mxu1 }
 0x113   : > { %v908_v53 = vadd.f32 %v907_v51, %v906_v48  ;;  %v936_v54 = vadd.f32 %v935_v52, %v934_v49  ;;  %v909_v55 = vpop.f32.mrb[2].mxu0  ;;  %v937_v56 = vpop.f32.mrb[2].mxu1 }
 0x114   : > { %v910_v57 = vpop.f32.mrb[3].mxu0  ;;  %v938_v58 = vpop.f32.mrb[3].mxu1 }
 0x115   : > { %v464_v59 = vadd.f32 %v908_v53, %v1270_v50  ;;  %v542_v60 = vadd.f32 %v936_v54, %v1270_v50  ;;  %v911_v61 = vadd.f32 %v910_v57, %v909_v55  ;;  %v939_v62 = vadd.f32 %v938_v58, %v937_v56 }
 0x117   : > { %v478_v63 = vmax.f32 %v464_v59, 0.0  ;;  %v556_v0 = vmax.f32 %v542_v60, 0.0  ;;  %v467_v1 = vadd.f32 %v911_v61, %v1270_v50  ;;  %v545_v2 = vadd.f32 %v939_v62, %v1270_v50 }
 0x119   : > { %v560_v3 = vmax.f32 %v478_v63, %v556_v0  ;;  %v479_v4 = vmax.f32 %v467_v1, 0.0  ;;  %v557_v5 = vmax.f32 %v545_v2, 0.0  ;;  %v912_v6 = vpop.f32.mrb[4].mxu0  ;;  %v940_v7 = vpop.f32.mrb[4].mxu1 }
 0x11a   : > { %v913_v8 = vpop.f32.mrb[5].mxu0  ;;  %v941_v9 = vpop.f32.mrb[5].mxu1 }
 0x11b   : > { %v561_v10 = vmax.f32 %v479_v4, %v557_v5  ;;  %v914_v11 = vadd.f32 %v913_v8, %v912_v6  ;;  %v942_v12 = vadd.f32 %v941_v9, %v940_v7  ;;  %v915_v13 = vpop.f32.mrb[6].mxu0  ;;  %v943_v14 = vpop.f32.mrb[6].mxu1 }
 0x11c   : > { %v916_v15 = vpop.f32.mrb[7].mxu0  ;;  %v944_v16 = vpop.f32.mrb[7].mxu1 }
 0x11d   : > { %v472_v17 = vadd.f32 %v914_v11, %v1270_v50  ;;  %v550_v18 = vadd.f32 %v942_v12, %v1270_v50  ;;  %v917_v19 = vadd.f32 %v916_v15, %v915_v13  ;;  %v945_v20 = vadd.f32 %v944_v16, %v943_v14 }
 0x11f   : > { %v480_v21 = vmax.f32 %v472_v17, 0.0  ;;  %v558_v22 = vmax.f32 %v550_v18, 0.0  ;;  %v475_v23 = vadd.f32 %v917_v19, %v1270_v50  ;;  %v553_v24 = vadd.f32 %v945_v20, %v1270_v50 }
 0x121   : > { %v562_v25 = vmax.f32 %v480_v21, %v558_v22  ;;  %v481_v26 = vmax.f32 %v475_v23, 0.0  ;;  %v559_v27 = vmax.f32 %v553_v24, 0.0 }
 0x123   : > { %v563_v28 = vmax.f32 %v481_v26, %v559_v27 }
 0x131   : > { %v962_v29 = vpop.f32.mrb[8].mxu0  ;;  %v990_v30 = vpop.f32.mrb[8].mxu1 }
 0x132   : > { %v963_v31 = vpop.f32.mrb[9].mxu0  ;;  %v991_v32 = vpop.f32.mrb[9].mxu1 }
 0x133   : > { %v964_v33 = vadd.f32 %v963_v31, %v962_v29  ;;  %v992_v34 = vadd.f32 %v991_v32, %v990_v30  ;;  %v965_v35 = vpop.f32.mrb[10].mxu0  ;;  %v993_v36 = vpop.f32.mrb[10].mxu1 }
 0x134   : > { %v966_v37 = vpop.f32.mrb[11].mxu0  ;;  %v994_v38 = vpop.f32.mrb[11].mxu1 }
 0x135   : > { %v624_v39 = vadd.f32 %v964_v33, %v1270_v50  ;;  %v706_v40 = vadd.f32 %v992_v34, %v1270_v50  ;;  %v967_v41 = vadd.f32 %v966_v37, %v965_v35  ;;  %v995_v42 = vadd.f32 %v994_v38, %v993_v36 }
 0x137   : > { %v638_v43 = vmax.f32 %v624_v39, 0.0  ;;  %v720_v44 = vmax.f32 %v706_v40, 0.0  ;;  %v627_v45 = vadd.f32 %v967_v41, %v1270_v50  ;;  %v709_v46 = vadd.f32 %v995_v42, %v1270_v50 }
 0x139   : > { %v642_v47 = vmax.f32 %v560_v3, %v638_v43  ;;  %v639_v48 = vmax.f32 %v627_v45, 0.0  ;;  %v968_v49 = vpop.f32.mrb[12].mxu0  ;;  %v996_v51 = vpop.f32.mrb[12].mxu1  ;;  %v721_v52 = vmax.f32 %v709_v46, 0.0 }
 0x13a   : > { %v969_v53 = vpop.f32.mrb[13].mxu0  ;;  %v997_v54 = vpop.f32.mrb[13].mxu1 }
 0x13b   : > { %v724_v55 = vmax.f32 %v642_v47, %v720_v44  ;;  %v643_v56 = vmax.f32 %v561_v10, %v639_v48  ;;  %v970_v57 = vadd.f32 %v969_v53, %v968_v49  ;;  %v998_v58 = vadd.f32 %v997_v54, %v996_v51  ;;  %v971_v59 = vpop.f32.mrb[14].mxu0  ;;  %v999_v60 = vpop.f32.mrb[14].mxu1 }
 0x13c   : > { %v972_v61 = vpop.f32.mrb[15].mxu0  ;;  %v1000_v62 = vpop.f32.mrb[15].mxu1 }
 0x13d   : > { %v725_v63 = vmax.f32 %v643_v56, %v721_v52  ;;  %v632_v0 = vadd.f32 %v970_v57, %v1270_v50  ;;  %v714_v1 = vadd.f32 %v998_v58, %v1270_v50  ;;  %v973_v2 = vadd.f32 %v972_v61, %v971_v59 }
 0x13e   : > { %v1001_v3 = vadd.f32 %v1000_v62, %v999_v60 }
 0x13f   : > { %v882_v4 = vpack.c.bf16 %v725_v63, %v724_v55  ;;  %v640_v5 = vmax.f32 %v632_v0, 0.0  ;;  %v722_v6 = vmax.f32 %v714_v1, 0.0  ;;  %v635_v7 = vadd.f32 %v973_v2, %v1270_v50 }
 0x140   : > { %v717_v8 = vadd.f32 %v1001_v3, %v1270_v50 }
 0x141   : > { %883 = vst [vmem:[%s267_s23] sm:$0xff] %v882_v4   ;;  %v644_v9 = vmax.f32 %v562_v25, %v640_v5  ;;  %v641_v10 = vmax.f32 %v635_v7, 0.0 }
 0x142   : > { %v723_v13 = vmax.f32 %v717_v8, 0.0 }
 0x143   : > { %v726_v11 = vmax.f32 %v644_v9, %v722_v6  ;;  %v645_v12 = vmax.f32 %v563_v28, %v641_v10 }
 0x145   : > { %v727_v14 = vmax.f32 %v645_v12, %v723_v13 }
 0x147   : > { %v887_v15 = vpack.c.bf16 %v727_v14, %v726_v11 }
 0x149   : > { %889 = vst [vmem:[%s267_s23 + $0x8] sm:$0xff] %v887_v15  }
 0x14a PF: > { %p10_p9 = scmp.ge.s32.totalorder %s1127_s16, 4   ;;  %s1307_s12 = smov %s1084_s13 }
 0x14b   : > { %s1308_s13 = smov %s1136_s19  ;;  %s1309_s14 = smov %s1127_s16 }
 0x14c   :  { %12 = sbr.rel (!%p10_p9) target bundleno = 2 (0x2), region = 108 }

// kernel: net_forward.5
= control target key start
LH: loop header
LB: loop body
LE: loop exit
PB: predicated region body
PF: predicated region fallthrough
CT: control target
= control target key end

     0   :  { %v862_v34 = vmov 0.0   ;;  %vm863_vm0 = vmmov 0   ;;  %s1090_s1 = inlined_call_operand.vmem [shape: bf16[512,128], index: 1, kind: input, shape index: {}]   ;;  %s1091_s0 = inlined_call_operand.vmem [shape: bf16[16,512], index: 0, kind: input, shape index: {}]   ;;  %s1092_s3 = inlined_call_operand.vmem [shape: bf16[128,128], index: 3, kind: input, shape index: {}]   ;;  %s1093_s5 = inlined_call_operand.vmem [shape: bf16[128,128], index: 5, kind: input, shape index: {}]   ;;  %s1094_s2 = inlined_call_operand.vmem [shape: f32[1,128], index: 2, kind: input, shape index: {}]   ;;  %s1095_s4 = inlined_call_operand.vmem [shape: f32[1,128], index: 4, kind: input, shape index: {}]   ;;  %s1096_s6 = inlined_call_operand.vmem [shape: f32[1,128], index: 6, kind: input, shape index: {}]   ;;  %s1097_s7 = inlined_call_operand.vmem [shape: bf16[16,128], index: 7, kind: output, shape index: {}]  }
   0x1   :  { %v808_v0 = vld [vmem:[%s1090_s1 + $0x40] sm:$0xff]   ;;  %v812_v4 = vld [vmem:[%s1090_s1 + $0x48] sm:$0xff]   ;;  %v816_v8 = vld [vmem:[%s1090_s1 + $0x50] sm:$0xff]  }
   0x2   :  { %v809_v1 = vld [vmem:[%s1090_s1 + $0xc0] sm:$0xff]   ;;  %704 = vmatprep.subr.bf16.mxu0 %v808_v0  ;;  %v813_v5 = vld [vmem:[%s1090_s1 + $0xc8] sm:$0xff]   ;;  %v817_v9 = vld [vmem:[%s1090_s1 + $0xd0] sm:$0xff]  }
   0x3   :  { %v810_v2 = vld [vmem:[%s1090_s1] sm:$0xff]   ;;  %726 = vmatprep.subr.bf16.mxu1 %v809_v1  ;;  %v814_v6 = vld [vmem:[%s1090_s1 + $0x8] sm:$0xff]   ;;  %v818_v10 = vld [vmem:[%s1090_s1 + $0x10] sm:$0xff]  }
   0x4   :  { %v811_v3 = vld [vmem:[%s1090_s1 + $0x80] sm:$0xff]   ;;  %705 = vmatpush3.bf16.msra.mxu0 %v810_v2  ;;  %v815_v7 = vld [vmem:[%s1090_s1 + $0x88] sm:$0xff]   ;;  %v819_v11 = vld [vmem:[%s1090_s1 + $0x90] sm:$0xff]  }
   0x5   :  { %727 = vmatpush3.bf16.msra.mxu1 %v811_v3  ;;  %706 = vmatprep.subr.bf16.mxu0 %v812_v4  ;;  %v820_v12 = vld [vmem:[%s1090_s1 + $0x58] sm:$0xff]   ;;  %v824_v16 = vld [vmem:[%s1090_s1 + $0x60] sm:$0xff]   ;;  %v828_v20 = vld [vmem:[%s1090_s1 + $0x68] sm:$0xff]  }
   0x6   :  { %728 = vmatprep.subr.bf16.mxu1 %v813_v5  ;;  %v821_v13 = vld [vmem:[%s1090_s1 + $0xd8] sm:$0xff]   ;;  %v825_v17 = vld [vmem:[%s1090_s1 + $0xe0] sm:$0xff]   ;;  %v829_v21 = vld [vmem:[%s1090_s1 + $0xe8] sm:$0xff]  }
   0x7   :  { %v822_v14 = vld [vmem:[%s1090_s1 + $0x18] sm:$0xff]   ;;  %v826_v18 = vld [vmem:[%s1090_s1 + $0x20] sm:$0xff]   ;;  %v830_v22 = vld [vmem:[%s1090_s1 + $0x28] sm:$0xff]  }
   0x8   :  { %707 = vmatpush3.bf16.msra.mxu0 %v814_v6  ;;  %v823_v15 = vld [vmem:[%s1090_s1 + $0x98] sm:$0xff]   ;;  %v827_v19 = vld [vmem:[%s1090_s1 + $0xa0] sm:$0xff]   ;;  %v831_v23 = vld [vmem:[%s1090_s1 + $0xa8] sm:$0xff]  }
   0x9   :  { %729 = vmatpush3.bf16.msra.mxu1 %v815_v7  ;;  %708 = vmatprep.subr.bf16.mxu0 %v816_v8  ;;  %v832_v24 = vld [vmem:[%s1090_s1 + $0x70] sm:$0xff]   ;;  %v836_v28 = vld [vmem:[%s1090_s1 + $0x78] sm:$0xff]   ;;  %v846_v37 = vld [vmem:[%s1092_s3] sm:$0xff]  }
   0xa   :  { %730 = vmatprep.subr.bf16.mxu1 %v817_v9  ;;  %v833_v25 = vld [vmem:[%s1090_s1 + $0xf0] sm:$0xff]   ;;  %v837_v29 = vld [vmem:[%s1090_s1 + $0xf8] sm:$0xff]   ;;  %v847_v38 = vld [vmem:[%s1092_s3 + $0x8] sm:$0xff]  }
   0xb   :  { %v834_v26 = vld [vmem:[%s1090_s1 + $0x30] sm:$0xff]   ;;  %v838_v30 = vld [vmem:[%s1090_s1 + $0x38] sm:$0xff]   ;;  %v850_v41 = vld [vmem:[%s1092_s3 + $0x20] sm:$0xff]  }
   0xc   :  { %709 = vmatpush3.bf16.msra.mxu0 %v818_v10  ;;  %v835_v27 = vld [vmem:[%s1090_s1 + $0xb0] sm:$0xff]   ;;  %v839_v31 = vld [vmem:[%s1090_s1 + $0xb8] sm:$0xff]   ;;  %v851_v42 = vld [vmem:[%s1092_s3 + $0x28] sm:$0xff]  }
   0xd   :  { %731 = vmatpush3.bf16.msra.mxu1 %v819_v11  ;;  %710 = vmatprep.subr.bf16.mxu0 %v820_v12  ;;  %v840_v32 = vld [vmem:[%s1091_s0] ss:$16 sps:$4 sm:$0xff]   ;;  %v842_v33 = vld [vmem:[%s1091_s0 + $0x4] ss:$16 sps:$4 sm:$0xff]   ;;  %v843_v35 = vld [vmem:[%s1091_s0 + $0x8] ss:$16 sps:$4 sm:$0xff]  }
   0xe   :  { %732 = vmatprep.subr.bf16.mxu1 %v821_v13  ;;  %v845_v36 = vld [vmem:[%s1091_s0 + $0xc] ss:$16 sps:$4 sm:$0xff]   ;;  %346 = vmatprep.mubr.bf16.mxu0 %v842_v33  ;;  %v848_v39 = vld [vmem:[%s1092_s3 + $0x10] sm:$0xff]   ;;  %v854_v45 = vld [vmem:[%s1093_s5] sm:$0xff]  }
   0xf   :  { %387 = vmatprep.mubr.bf16.mxu1 %v845_v36  ;;  %v849_v40 = vld [vmem:[%s1092_s3 + $0x18] sm:$0xff]   ;;  %v852_v43 = vld [vmem:[%s1092_s3 + $0x30] sm:$0xff]   ;;  %v855_v46 = vld [vmem:[%s1093_s5 + $0x8] sm:$0xff]  }
  0x10   :  { %711 = vmatpush3.bf16.msra.mxu0 %v822_v14  ;;  %v853_v44 = vld [vmem:[%s1092_s3 + $0x38] sm:$0xff]   ;;  %v856_v47 = vld [vmem:[%s1093_s5 + $0x10] sm:$0xff]   ;;  %v858_v49 = vld [vmem:[%s1093_s5 + $0x20] sm:$0xff]  }
  0x11   :  { %733 = vmatpush3.bf16.msra.mxu1 %v823_v15  ;;  %712 = vmatprep.subr.bf16.mxu0 %v824_v16  ;;  %v857_v48 = vld [vmem:[%s1093_s5 + $0x18] sm:$0xff]   ;;  %v859_v50 = vld [vmem:[%s1093_s5 + $0x28] sm:$0xff]   ;;  %v640_v53 = vld [vmem:[%s1094_s2] ss:$0 sm:$0xff] }
  0x12   :  { %734 = vmatprep.subr.bf16.mxu1 %v825_v17  ;;  %v860_v7 = vld [vmem:[%s1093_s5 + $0x30] sm:$0xff]   ;;  %v861_v8 = vld [vmem:[%s1093_s5 + $0x38] sm:$0xff]   ;;  %v677_v9 = vld [vmem:[%s1095_s4] ss:$0 sm:$0xff] }
  0x14   :  { %713 = vmatpush3.bf16.msra.mxu0 %v826_v18 }
  0x15   :  { %735 = vmatpush3.bf16.msra.mxu1 %v827_v19  ;;  %714 = vmatprep.subr.bf16.mxu0 %v828_v20  ;;  %v686_v19 = vld [vmem:[%s1096_s6] ss:$0 sm:$0xff] }
  0x16   :  { %736 = vmatprep.subr.bf16.mxu1 %v829_v21 }
  0x18   :  { %715 = vmatpush3.bf16.msra.mxu0 %v830_v22 }
  0x19   :  { %737 = vmatpush3.bf16.msra.mxu1 %v831_v23  ;;  %716 = vmatprep.subr.bf16.mxu0 %v832_v24 }
  0x1a   :  { %738 = vmatprep.subr.bf16.mxu1 %v833_v25 }
  0x1c   :  { %717 = vmatpush3.bf16.msra.mxu0 %v834_v26 }
  0x1d   :  { %739 = vmatpush3.bf16.msra.mxu1 %v835_v27  ;;  %718 = vmatprep.subr.bf16.mxu0 %v836_v28 }
  0x1e   :  { %740 = vmatprep.subr.bf16.mxu1 %v837_v29 }
  0x20   :  { %719 = vmatpush3.bf16.msra.mxu0 %v838_v30 }
  0x21   :  { %741 = vmatpush3.bf16.msra.mxu1 %v839_v31  ;;  %766 = vmatprep.subr.bf16.mxu0 %v862_v34 }
  0x22   :  { %786 = vmatprep.subr.bf16.mxu1 %v862_v34 }
  0x23   :  { %347 = vmatmul.mubr.bf16.vlgmr.msra.gmra.mrb[0].mxu0 %v840_v32 }
  0x24   :  { %388 = vmatmul.mubr.bf16.vlgmr.msra.gmra.mrb[0].mxu1 %v843_v35  ;;  %767 = vmatpush3.bf16.msra.mxu0 %v846_v37 }
  0x25   :  { %768 = vmatprep.subr.bf16.mxu0 %v862_v34  ;;  %782 = vmatprep.mubr.msk.bf16.mxu0 %vm863_vm0, %v862_v34 }
  0x26   :  { %802 = vmatprep.mubr.msk.bf16.mxu1 %vm863_vm0, %v862_v34  ;;  %787 = vmatpush3.bf16.msra.mxu1 %v854_v45 }
  0x27   :  { %788 = vmatprep.subr.bf16.mxu1 %v862_v34 }
  0x28   :  { %769 = vmatpush3.bf16.msra.mxu0 %v847_v38 }
  0x29   :  { %770 = vmatprep.subr.bf16.mxu0 %v862_v34 }
  0x2a   :  { %789 = vmatpush3.bf16.msra.mxu1 %v855_v46 }
  0x2b   :  { %790 = vmatprep.subr.bf16.mxu1 %v862_v34 }
  0x2c   :  { %771 = vmatpush3.bf16.msra.mxu0 %v848_v39 }
  0x2d   :  { %772 = vmatprep.subr.bf16.mxu0 %v862_v34 }
  0x2e   :  { %791 = vmatpush3.bf16.msra.mxu1 %v856_v47 }
  0x2f   :  { %792 = vmatprep.subr.bf16.mxu1 %v862_v34 }
  0x30   :  { %773 = vmatpush3.bf16.msra.mxu0 %v849_v40 }
  0x31   :  { %774 = vmatprep.subr.bf16.mxu0 %v862_v34 }
  0x32   :  { %793 = vmatpush3.bf16.msra.mxu1 %v857_v48 }
  0x33   :  { %794 = vmatprep.subr.bf16.mxu1 %v862_v34 }
  0x34   :  { %775 = vmatpush3.bf16.msra.mxu0 %v850_v41 }
  0x35   :  { %776 = vmatprep.subr.bf16.mxu0 %v862_v34 }
  0x36   :  { %795 = vmatpush3.bf16.msra.mxu1 %v858_v49 }
  0x37   :  { %796 = vmatprep.subr.bf16.mxu1 %v862_v34 }
  0x38   :  { %777 = vmatpush3.bf16.msra.mxu0 %v851_v42 }
  0x39   :  { %778 = vmatprep.subr.bf16.mxu0 %v862_v34 }
  0x3a   :  { %797 = vmatpush3.bf16.msra.mxu1 %v859_v50 }
  0x3b   :  { %798 = vmatprep.subr.bf16.mxu1 %v862_v34 }
  0x3c   :  { %779 = vmatpush3.bf16.msra.mxu0 %v852_v43 }
  0x3d   :  { %780 = vmatprep.subr.bf16.mxu0 %v862_v34 }
  0x3e   :  { %799 = vmatpush3.bf16.msra.mxu1 %v860_v7 }
  0x3f   :  { %800 = vmatprep.subr.bf16.mxu1 %v862_v34 }
  0x40   :  { %781 = vmatpush3.bf16.msra.mxu0 %v853_v44 }
  0x42   :  { %801 = vmatpush3.bf16.msra.mxu1 %v861_v8 }
  0xf6   :  { %v720_v51 = vpop.f32.mrb[0].mxu0 }
  0xf7   :  { %v742_v52 = vpop.f32.mrb[0].mxu1  ;;  %v721_v54 = vpop.f32.mrb[1].mxu0 }
  0xf8   :  { %v722_v55 = vadd.f32 %v721_v54, %v720_v51  ;;  %v743_v56 = vpop.f32.mrb[1].mxu1  ;;  %v723_v57 = vpop.f32.mrb[2].mxu0 }
  0xf9   :  { %v744_v58 = vadd.f32 %v743_v56, %v742_v52  ;;  %v745_v59 = vpop.f32.mrb[2].mxu1  ;;  %v724_v60 = vpop.f32.mrb[3].mxu0 }
  0xfa   :  { %v349_v61 = vadd.f32 %v722_v55, %v640_v53  ;;  %v725_v62 = vadd.f32 %v724_v60, %v723_v57  ;;  %v746_v63 = vpop.f32.mrb[3].mxu1 }
  0xfb   :  { %v747_v0 = vadd.f32 %v746_v63, %v745_v59 }
  0xfc   :  { %v390_v1 = vadd.f32 %v744_v58, %v349_v61  ;;  %v352_v2 = vadd.f32 %v725_v62, %v640_v53 }
  0xfe   :  { %v393_v3 = vadd.f32 %v747_v0, %v352_v2  ;;  %v396_v4 = vmax.f32 %v390_v1, 0.0 }
 0x100   :  { %v397_v5 = vmax.f32 %v393_v3, 0.0 }
 0x102   :  { %v398_v6 = vpack.c.bf16 %v397_v5, %v396_v4 }
 0x104   :  { %783 = vmatmul.mubr.bf16.vlgmr.msra.gmra.mrb[4].mxu0 %v398_v6 }
 0x1d7   :  { %v504_v10 = vpop.f32.mrb[4].mxu0 }
 0x1d8   :  { %v505_v11 = vadd.f32 %v677_v9, %v504_v10  ;;  %v784_v12 = vpop.f32.mrb[5].mxu0 }
 0x1d9   :  { %v507_v13 = vpop.f32.mrb[6].mxu0 }
 0x1da   :  { %v508_v14 = vadd.f32 %v677_v9, %v507_v13  ;;  %v785_v15 = vpop.f32.mrb[7].mxu0  ;;  %v511_v16 = vmax.f32 %v505_v11, 0.0 }
 0x1dc   :  { %v512_v17 = vmax.f32 %v508_v14, 0.0 }
 0x1de   :  { %v513_v18 = vpack.c.bf16 %v512_v17, %v511_v16 }
 0x1e0   :  { %803 = vmatmul.mubr.bf16.vlgmr.msra.gmra.mrb[4].mxu1 %v513_v18 }
 0x2b3   :  { %v619_v20 = vpop.f32.mrb[4].mxu1 }
 0x2b4   :  { %v804_v21 = vpop.f32.mrb[5].mxu1  ;;  %v620_v23 = vadd.f32 %v686_v19, %v619_v20 }
 0x2b5   :  { %v622_v22 = vpop.f32.mrb[6].mxu1 }
 0x2b6   :  { %v623_v24 = vadd.f32 %v686_v19, %v622_v22  ;;  %v805_v25 = vpop.f32.mrb[7].mxu1 }
 0x2b8   :  { %v702_v26 = vpack.c.bf16 %v623_v24, %v620_v23 }
 0x2ba   :  { %703 = vst [vmem:[%s1097_s7] sm:$0xff] %v702_v26  }

</bundles_post_ra>
